<compile_context>
chip_gen: v7x
topology: tpu7x:2x2x1
jax: 0.10.0
libtpu: 0.0.40
codegen_flags: <defaults>
</compile_context>

<pallas_src>
import functools

import jax
import jax.numpy as jnp
from jax.experimental import pallas as pl
from jax.experimental.pallas import tpu as pltpu


# ----------------------------------------------------------------------------
# Fused forward kernel: one grid step per batch element.
# ----------------------------------------------------------------------------
def _fused_model_kernel(x_ref, w1p_ref, b1_ref, w2p_ref, b2_ref,
                        pool_ref, fw1_ref, fb1_ref, fw2_ref, fb2_ref,
                        o_ref, *, K, Ho1, Ho2, n_pool):
    x = x_ref[0]                                        # (H, W*Cin) bf16, lane-dense

    # ---- conv1 + bias + ReLU -> lane-dense (Ho1, Wo1*C1) ----
    acc1 = jnp.zeros((Ho1, w1p_ref.shape[2]), jnp.float32)
    for kh in range(K):                                 # 5 MXU matmuls, sublane-only taps
        acc1 = acc1 + jax.lax.dot_general(
            x[kh:kh + Ho1, :], w1p_ref[kh],
            (((1,), (0,)), ((), ())), preferred_element_type=jnp.float32)
    y1 = jnp.maximum(acc1 + b1_ref[...], 0.0)           # (12, 384) f32

    # ---- conv2 + bias + ReLU -> lane-dense (Ho2, Wo2*C2) ----
    acc2 = jnp.zeros((Ho2, w2p_ref.shape[2]), jnp.float32)
    for kh in range(K):
        acc2 = acc2 + jax.lax.dot_general(
            y1[kh:kh + Ho2, :].astype(jnp.bfloat16), w2p_ref[kh],
            (((1,), (0,)), ((), ())), preferred_element_type=jnp.float32)
    y2 = jnp.maximum(acc2 + b2_ref[...], 0.0)           # (8, 256) f32

    # ---- AdaptiveAvgPool2d((1,1)): sublane sum, then fold the Wo2 lane groups
    #      with a constant (Wo2*C2, C2) selector matmul, then normalize. ----
    rsum = jnp.sum(y2, axis=0, keepdims=True)           # (1, 256)
    pooled = jax.lax.dot_general(
        rsum, pool_ref[...], (((1,), (0,)), ((), ())),
        preferred_element_type=jnp.float32) * (1.0 / n_pool)   # (1, 32)

    # ---- fc1 + ReLU ----
    h = jnp.dot(pooled.astype(jnp.bfloat16), fw1_ref[...],
                preferred_element_type=jnp.float32) + fb1_ref[...]
    h = jnp.maximum(h, 0.0)                             # (1, 4096)

    # TODO(synk): Dropout(p=0.5) is an eval-mode identity here; training-mode
    # masking (pltpu.prng_seed / prng_random_bits) is not implemented.

    # ---- fc2 (4096 -> 1): VPU multiply + lane reduction (skip 1-wide MXU dot) ----
    s = jnp.sum(h * fw2_ref[...], axis=-1, keepdims=True) + fb2_ref[...]   # (1, 1)
    o_ref[...] = jnp.broadcast_to(s.reshape(1, 1, 1), o_ref.shape)


# ----------------------------------------------------------------------------
# Weight packing (layout plumbing, runs in XLA outside the kernel):
#   (K, K, Cin, Cout) -> (K, W_in*Cin, Wo*Cout) row-slab matrices so that
#   conv = sum_kh  x_rows[kh:kh+Ho, :] @ packed[kh]
# ----------------------------------------------------------------------------
def _pack_conv_weight(w_hwio, w_in):
    k, _, cin, cout = w_hwio.shape
    wo_n = w_in - k + 1
    w_idx = jnp.arange(w_in)[:, None]                   # (W, 1)
    wo_idx = jnp.arange(wo_n)[None, :]                  # (1, Wo)
    kw = w_idx - wo_idx                                 # (W, Wo)
    valid = (kw >= 0) & (kw < k)
    gathered = w_hwio[:, jnp.clip(kw, 0, k - 1), :, :]  # (K, W, Wo, Cin, Cout)
    gathered = jnp.where(valid[None, :, :, None, None], gathered, 0.0)
    packed = jnp.transpose(gathered, (0, 1, 3, 2, 4))   # (K, W, Cin, Wo, Cout)
    return packed.reshape(k, w_in * cin, wo_n * cout)


# ----------------------------------------------------------------------------
# Parameter init (mimics PyTorch default uniform(-1/sqrt(fan_in), +1/sqrt(fan_in)))
# ----------------------------------------------------------------------------
def init_params(key):
    ks = jax.random.split(key, 8)

    def unif(k, shape, fan_in):
        bound = 1.0 / jnp.sqrt(jnp.float32(fan_in))
        return jax.random.uniform(k, shape, jnp.float32, -bound, bound)

    w1 = unif(ks[0], (5, 5, 3, 32), 3 * 5 * 5)     # conv1 (KH, KW, Cin, Cout)
    b1 = unif(ks[1], (1, 32), 3 * 5 * 5)
    w2 = unif(ks[2], (5, 5, 32, 32), 32 * 5 * 5)   # conv2
    b2 = unif(ks[3], (1, 32), 32 * 5 * 5)
    fw1 = unif(ks[4], (32, 4096), 32)              # fc1 (in, out)
    fb1 = unif(ks[5], (1, 4096), 32)
    fw2 = unif(ks[6], (4096, 1), 4096)             # fc2
    fb2 = unif(ks[7], (1, 1), 4096)
    return dict(w1=w1, b1=b1, w2=w2, b2=b2, fw1=fw1, fb1=fb1, fw2=fw2, fb2=fb2)


# ----------------------------------------------------------------------------
# Forward: NCHW input -> (N, 1)
# ----------------------------------------------------------------------------
@jax.jit
def custom_model_forward(x_nchw, params):
    N, Cin, H, W = x_nchw.shape
    K = params["w1"].shape[0]
    C1 = params["w1"].shape[-1]
    C2 = params["w2"].shape[-1]
    Ho1, Wo1 = H - K + 1, W - K + 1
    Ho2, Wo2 = Ho1 - K + 1, Wo1 - K + 1

    # NCHW -> NHWC -> lane-dense row slabs (N, H, W*Cin); channels ride the lane axis.
    x = jnp.transpose(x_nchw, (0, 2, 3, 1)).astype(jnp.float32)
    x_rows = x.reshape(N, H, W * Cin).astype(jnp.bfloat16)

    # Pre-pack weights (done in XLA; kernel only sees matmul-ready slabs).
    w1p = _pack_conv_weight(params["w1"], W).astype(jnp.bfloat16)       # (5, 48, 384)
    w2p = _pack_conv_weight(params["w2"], Wo1).astype(jnp.bfloat16)     # (5, 384, 256)
    b1w = jnp.tile(params["b1"], (1, Wo1))                              # (1, 384) f32
    b2w = jnp.tile(params["b2"], (1, Wo2))                              # (1, 256) f32
    pool_mat = jnp.tile(jnp.eye(C2, dtype=jnp.float32), (Wo2, 1))       # (256, 32) f32
    fw1 = params["fw1"].astype(jnp.bfloat16)                            # (32, 4096)
    fb1 = params["fb1"]                                                 # (1, 4096) f32
    fw2_row = params["fw2"].reshape(1, -1)                              # (1, 4096) f32
    fb2 = params["fb2"]                                                 # (1, 1) f32

    kernel = functools.partial(_fused_model_kernel, K=K, Ho1=Ho1, Ho2=Ho2,
                               n_pool=float(Ho2 * Wo2))

    out = pl.pallas_call(
        kernel,
        out_shape=jax.ShapeDtypeStruct((N, 1, 128), jnp.float32),
        grid=(N,),
        in_specs=[
            pl.BlockSpec((1, H, W * Cin), lambda n: (n, 0, 0)),
            pl.BlockSpec(w1p.shape, lambda n: (0, 0, 0)),
            pl.BlockSpec(b1w.shape, lambda n: (0, 0)),
            pl.BlockSpec(w2p.shape, lambda n: (0, 0, 0)),
            pl.BlockSpec(b2w.shape, lambda n: (0, 0)),
            pl.BlockSpec(pool_mat.shape, lambda n: (0, 0)),
            pl.BlockSpec(fw1.shape, lambda n: (0, 0)),
            pl.BlockSpec(fb1.shape, lambda n: (0, 0)),
            pl.BlockSpec(fw2_row.shape, lambda n: (0, 0)),
            pl.BlockSpec(fb2.shape, lambda n: (0, 0)),
        ],
        out_specs=pl.BlockSpec((1, 1, 128), lambda n: (n, 0, 0)),
        compiler_params=pltpu.CompilerParams(
            dimension_semantics=("parallel",)),
    )(x_rows, w1p, b1w, w2p, b2w, pool_mat, fw1, fb1, fw2_row, fb2)

    return out[:, 0, :1]                                                # (N, 1)


if __name__ == "__main__":
    key = jax.random.PRNGKey(0)
    k_in, k_par = jax.random.split(key)
    # Shapes consistent with the module: batch=2, in_channels=3, spatial=16.
    x = jax.random.normal(k_in, (2, 3, 16, 16), jnp.float32)
    params = init_params(k_par)

    out = custom_model_forward(x, params)
    jax.block_until_ready(out)
    assert out.shape == (2, 1) and out.dtype == jnp.float32
    print("KERNEL_OK")
</pallas_src>

<mosaic_0001>
module attributes {stable_mosaic.version = 11 : i64} {
  func.func @_fused_model_kernel(%arg0: i32, %arg1: memref<1x16x48xbf16, #tpu.memory_space<vmem>>, %arg2: memref<5x48x384xbf16, #tpu.memory_space<vmem>>, %arg3: memref<1x384xf32, #tpu.memory_space<vmem>>, %arg4: memref<5x384x256xbf16, #tpu.memory_space<vmem>>, %arg5: memref<1x256xf32, #tpu.memory_space<vmem>>, %arg6: memref<256x32xf32, #tpu.memory_space<vmem>>, %arg7: memref<32x4096xbf16, #tpu.memory_space<vmem>>, %arg8: memref<1x4096xf32, #tpu.memory_space<vmem>>, %arg9: memref<1x4096xf32, #tpu.memory_space<vmem>>, %arg10: memref<1x1xf32, #tpu.memory_space<vmem>>, %arg11: memref<1x1x128xf32, #tpu.memory_space<vmem>>) attributes {dimension_semantics = [#tpu.dimension_semantics<parallel>], iteration_bounds = array<i64: 2>, scalar_prefetch = 0 : i64, scratch_operands = 0 : i64, tpu.core_type = #tpu.core_type<tc>, window_params = [{transform_indices = @transform_0, window_bounds = array<i64: 1, 16, 48>}, {pipeline_mode = #tpu.pipeline_mode<synchronous>, transform_indices = @transform_1, window_bounds = array<i64: 5, 48, 384>}, {pipeline_mode = #tpu.pipeline_mode<synchronous>, transform_indices = @transform_2, window_bounds = array<i64: 1, 384>}, {pipeline_mode = #tpu.pipeline_mode<synchronous>, transform_indices = @transform_3, window_bounds = array<i64: 5, 384, 256>}, {pipeline_mode = #tpu.pipeline_mode<synchronous>, transform_indices = @transform_4, window_bounds = array<i64: 1, 256>}, {pipeline_mode = #tpu.pipeline_mode<synchronous>, transform_indices = @transform_5, window_bounds = array<i64: 256, 32>}, {pipeline_mode = #tpu.pipeline_mode<synchronous>, transform_indices = @transform_6, window_bounds = array<i64: 32, 4096>}, {pipeline_mode = #tpu.pipeline_mode<synchronous>, transform_indices = @transform_7, window_bounds = array<i64: 1, 4096>}, {pipeline_mode = #tpu.pipeline_mode<synchronous>, transform_indices = @transform_8, window_bounds = array<i64: 1, 4096>}, {pipeline_mode = #tpu.pipeline_mode<synchronous>, transform_indices = @transform_9, window_bounds = array<i64: 1, 1>}, {transform_indices = @transform_10, window_bounds = array<i64: 1, 1, 128>}]} {
    %c0 = arith.constant 0 : index
    %c0_0 = arith.constant 0 : index
    %c0_1 = arith.constant 0 : index
    %0 = vector.load %arg1[%c0, %c0_0, %c0_1] : memref<1x16x48xbf16, #tpu.memory_space<vmem>>, vector<1x16x48xbf16>
    %1 = vector.shape_cast %0 : vector<1x16x48xbf16> to vector<16x48xbf16>
    %cst = arith.constant 0.000000e+00 : f32
    %2 = vector.broadcast %cst : f32 to vector<12x384xf32>
    %3 = vector.extract_strided_slice %1 {offsets = [0, 0], sizes = [12, 48], strides = [1, 1]} : vector<16x48xbf16> to vector<12x48xbf16>
    %c0_2 = arith.constant 0 : index
    %c0_3 = arith.constant 0 : index
    %c0_4 = arith.constant 0 : index
    %4 = vector.load %arg2[%c0_2, %c0_3, %c0_4] : memref<5x48x384xbf16, #tpu.memory_space<vmem>>, vector<1x48x384xbf16>
    %5 = vector.shape_cast %4 : vector<1x48x384xbf16> to vector<48x384xbf16>
    %cst_5 = arith.constant dense<0.000000e+00> : vector<12x384xf32>
    %6 = tpu.matmul %3, %5, %cst_5 {dimension_numbers = #tpu.dot_dimension_numbers<[1], [0], [0], [1], [0, 0, 1, 1], [], []>} : vector<12x48xbf16>, vector<48x384xbf16>, vector<12x384xf32> -> vector<12x384xf32>
    %7 = arith.addf %2, %6 : vector<12x384xf32>
    %8 = vector.extract_strided_slice %1 {offsets = [1, 0], sizes = [12, 48], strides = [1, 1]} : vector<16x48xbf16> to vector<12x48xbf16>
    %c1 = arith.constant 1 : index
    %c0_6 = arith.constant 0 : index
    %c0_7 = arith.constant 0 : index
    %9 = vector.load %arg2[%c1, %c0_6, %c0_7] : memref<5x48x384xbf16, #tpu.memory_space<vmem>>, vector<1x48x384xbf16>
    %10 = vector.shape_cast %9 : vector<1x48x384xbf16> to vector<48x384xbf16>
    %cst_8 = arith.constant dense<0.000000e+00> : vector<12x384xf32>
    %11 = tpu.matmul %8, %10, %cst_8 {dimension_numbers = #tpu.dot_dimension_numbers<[1], [0], [0], [1], [0, 0, 1, 1], [], []>} : vector<12x48xbf16>, vector<48x384xbf16>, vector<12x384xf32> -> vector<12x384xf32>
    %12 = arith.addf %7, %11 : vector<12x384xf32>
    %13 = vector.extract_strided_slice %1 {offsets = [2, 0], sizes = [12, 48], strides = [1, 1]} : vector<16x48xbf16> to vector<12x48xbf16>
    %c2 = arith.constant 2 : index
    %c0_9 = arith.constant 0 : index
    %c0_10 = arith.constant 0 : index
    %14 = vector.load %arg2[%c2, %c0_9, %c0_10] : memref<5x48x384xbf16, #tpu.memory_space<vmem>>, vector<1x48x384xbf16>
    %15 = vector.shape_cast %14 : vector<1x48x384xbf16> to vector<48x384xbf16>
    %cst_11 = arith.constant dense<0.000000e+00> : vector<12x384xf32>
    %16 = tpu.matmul %13, %15, %cst_11 {dimension_numbers = #tpu.dot_dimension_numbers<[1], [0], [0], [1], [0, 0, 1, 1], [], []>} : vector<12x48xbf16>, vector<48x384xbf16>, vector<12x384xf32> -> vector<12x384xf32>
    %17 = arith.addf %12, %16 : vector<12x384xf32>
    %18 = vector.extract_strided_slice %1 {offsets = [3, 0], sizes = [12, 48], strides = [1, 1]} : vector<16x48xbf16> to vector<12x48xbf16>
    %c3 = arith.constant 3 : index
    %c0_12 = arith.constant 0 : index
    %c0_13 = arith.constant 0 : index
    %19 = vector.load %arg2[%c3, %c0_12, %c0_13] : memref<5x48x384xbf16, #tpu.memory_space<vmem>>, vector<1x48x384xbf16>
    %20 = vector.shape_cast %19 : vector<1x48x384xbf16> to vector<48x384xbf16>
    %cst_14 = arith.constant dense<0.000000e+00> : vector<12x384xf32>
    %21 = tpu.matmul %18, %20, %cst_14 {dimension_numbers = #tpu.dot_dimension_numbers<[1], [0], [0], [1], [0, 0, 1, 1], [], []>} : vector<12x48xbf16>, vector<48x384xbf16>, vector<12x384xf32> -> vector<12x384xf32>
    %22 = arith.addf %17, %21 : vector<12x384xf32>
    %23 = vector.extract_strided_slice %1 {offsets = [4, 0], sizes = [12, 48], strides = [1, 1]} : vector<16x48xbf16> to vector<12x48xbf16>
    %c4 = arith.constant 4 : index
    %c0_15 = arith.constant 0 : index
    %c0_16 = arith.constant 0 : index
    %24 = vector.load %arg2[%c4, %c0_15, %c0_16] : memref<5x48x384xbf16, #tpu.memory_space<vmem>>, vector<1x48x384xbf16>
    %25 = vector.shape_cast %24 : vector<1x48x384xbf16> to vector<48x384xbf16>
    %cst_17 = arith.constant dense<0.000000e+00> : vector<12x384xf32>
    %26 = tpu.matmul %23, %25, %cst_17 {dimension_numbers = #tpu.dot_dimension_numbers<[1], [0], [0], [1], [0, 0, 1, 1], [], []>} : vector<12x48xbf16>, vector<48x384xbf16>, vector<12x384xf32> -> vector<12x384xf32>
    %27 = arith.addf %22, %26 : vector<12x384xf32>
    %c0_18 = arith.constant 0 : index
    %c0_19 = arith.constant 0 : index
    %28 = vector.load %arg3[%c0_18, %c0_19] : memref<1x384xf32, #tpu.memory_space<vmem>>, vector<1x384xf32>
    %29 = vector.broadcast %28 : vector<1x384xf32> to vector<12x384xf32>
    %30 = arith.addf %27, %29 : vector<12x384xf32>
    %cst_20 = arith.constant 0.000000e+00 : f32
    %31 = vector.broadcast %cst_20 : f32 to vector<12x384xf32>
    %32 = arith.maximumf %30, %31 : vector<12x384xf32>
    %cst_21 = arith.constant 0.000000e+00 : f32
    %33 = vector.broadcast %cst_21 : f32 to vector<8x256xf32>
    %34 = vector.extract_strided_slice %32 {offsets = [0, 0], sizes = [8, 384], strides = [1, 1]} : vector<12x384xf32> to vector<8x384xf32>
    %35 = arith.truncf %34 : vector<8x384xf32> to vector<8x384xbf16>
    %c0_22 = arith.constant 0 : index
    %c0_23 = arith.constant 0 : index
    %c0_24 = arith.constant 0 : index
    %36 = vector.load %arg4[%c0_22, %c0_23, %c0_24] : memref<5x384x256xbf16, #tpu.memory_space<vmem>>, vector<1x384x256xbf16>
    %37 = vector.shape_cast %36 : vector<1x384x256xbf16> to vector<384x256xbf16>
    %cst_25 = arith.constant dense<0.000000e+00> : vector<8x256xf32>
    %38 = tpu.matmul %35, %37, %cst_25 {dimension_numbers = #tpu.dot_dimension_numbers<[1], [0], [0], [1], [0, 0, 1, 1], [], []>} : vector<8x384xbf16>, vector<384x256xbf16>, vector<8x256xf32> -> vector<8x256xf32>
    %39 = arith.addf %33, %38 : vector<8x256xf32>
    %40 = vector.extract_strided_slice %32 {offsets = [1, 0], sizes = [8, 384], strides = [1, 1]} : vector<12x384xf32> to vector<8x384xf32>
    %41 = arith.truncf %40 : vector<8x384xf32> to vector<8x384xbf16>
    %c1_26 = arith.constant 1 : index
    %c0_27 = arith.constant 0 : index
    %c0_28 = arith.constant 0 : index
    %42 = vector.load %arg4[%c1_26, %c0_27, %c0_28] : memref<5x384x256xbf16, #tpu.memory_space<vmem>>, vector<1x384x256xbf16>
    %43 = vector.shape_cast %42 : vector<1x384x256xbf16> to vector<384x256xbf16>
    %cst_29 = arith.constant dense<0.000000e+00> : vector<8x256xf32>
    %44 = tpu.matmul %41, %43, %cst_29 {dimension_numbers = #tpu.dot_dimension_numbers<[1], [0], [0], [1], [0, 0, 1, 1], [], []>} : vector<8x384xbf16>, vector<384x256xbf16>, vector<8x256xf32> -> vector<8x256xf32>
    %45 = arith.addf %39, %44 : vector<8x256xf32>
    %46 = vector.extract_strided_slice %32 {offsets = [2, 0], sizes = [8, 384], strides = [1, 1]} : vector<12x384xf32> to vector<8x384xf32>
    %47 = arith.truncf %46 : vector<8x384xf32> to vector<8x384xbf16>
    %c2_30 = arith.constant 2 : index
    %c0_31 = arith.constant 0 : index
    %c0_32 = arith.constant 0 : index
    %48 = vector.load %arg4[%c2_30, %c0_31, %c0_32] : memref<5x384x256xbf16, #tpu.memory_space<vmem>>, vector<1x384x256xbf16>
    %49 = vector.shape_cast %48 : vector<1x384x256xbf16> to vector<384x256xbf16>
    %cst_33 = arith.constant dense<0.000000e+00> : vector<8x256xf32>
    %50 = tpu.matmul %47, %49, %cst_33 {dimension_numbers = #tpu.dot_dimension_numbers<[1], [0], [0], [1], [0, 0, 1, 1], [], []>} : vector<8x384xbf16>, vector<384x256xbf16>, vector<8x256xf32> -> vector<8x256xf32>
    %51 = arith.addf %45, %50 : vector<8x256xf32>
    %52 = vector.extract_strided_slice %32 {offsets = [3, 0], sizes = [8, 384], strides = [1, 1]} : vector<12x384xf32> to vector<8x384xf32>
    %53 = arith.truncf %52 : vector<8x384xf32> to vector<8x384xbf16>
    %c3_34 = arith.constant 3 : index
    %c0_35 = arith.constant 0 : index
    %c0_36 = arith.constant 0 : index
    %54 = vector.load %arg4[%c3_34, %c0_35, %c0_36] : memref<5x384x256xbf16, #tpu.memory_space<vmem>>, vector<1x384x256xbf16>
    %55 = vector.shape_cast %54 : vector<1x384x256xbf16> to vector<384x256xbf16>
    %cst_37 = arith.constant dense<0.000000e+00> : vector<8x256xf32>
    %56 = tpu.matmul %53, %55, %cst_37 {dimension_numbers = #tpu.dot_dimension_numbers<[1], [0], [0], [1], [0, 0, 1, 1], [], []>} : vector<8x384xbf16>, vector<384x256xbf16>, vector<8x256xf32> -> vector<8x256xf32>
    %57 = arith.addf %51, %56 : vector<8x256xf32>
    %58 = vector.extract_strided_slice %32 {offsets = [4, 0], sizes = [8, 384], strides = [1, 1]} : vector<12x384xf32> to vector<8x384xf32>
    %59 = arith.truncf %58 : vector<8x384xf32> to vector<8x384xbf16>
    %c4_38 = arith.constant 4 : index
    %c0_39 = arith.constant 0 : index
    %c0_40 = arith.constant 0 : index
    %60 = vector.load %arg4[%c4_38, %c0_39, %c0_40] : memref<5x384x256xbf16, #tpu.memory_space<vmem>>, vector<1x384x256xbf16>
    %61 = vector.shape_cast %60 : vector<1x384x256xbf16> to vector<384x256xbf16>
    %cst_41 = arith.constant dense<0.000000e+00> : vector<8x256xf32>
    %62 = tpu.matmul %59, %61, %cst_41 {dimension_numbers = #tpu.dot_dimension_numbers<[1], [0], [0], [1], [0, 0, 1, 1], [], []>} : vector<8x384xbf16>, vector<384x256xbf16>, vector<8x256xf32> -> vector<8x256xf32>
    %63 = arith.addf %57, %62 : vector<8x256xf32>
    %c0_42 = arith.constant 0 : index
    %c0_43 = arith.constant 0 : index
    %64 = vector.load %arg5[%c0_42, %c0_43] : memref<1x256xf32, #tpu.memory_space<vmem>>, vector<1x256xf32>
    %65 = vector.broadcast %64 : vector<1x256xf32> to vector<8x256xf32>
    %66 = arith.addf %63, %65 : vector<8x256xf32>
    %cst_44 = arith.constant 0.000000e+00 : f32
    %67 = vector.broadcast %cst_44 : f32 to vector<8x256xf32>
    %68 = arith.maximumf %66, %67 : vector<8x256xf32>
    %cst_45 = arith.constant dense<0.000000e+00> : vector<256xf32>
    %69 = vector.multi_reduction <add>, %68, %cst_45 [0] : vector<8x256xf32> to vector<256xf32>
    %70 = vector.shape_cast %69 : vector<256xf32> to vector<1x256xf32>
    %c0_46 = arith.constant 0 : index
    %c0_47 = arith.constant 0 : index
    %71 = vector.load %arg6[%c0_46, %c0_47] : memref<256x32xf32, #tpu.memory_space<vmem>>, vector<256x32xf32>
    %cst_48 = arith.constant dense<0.000000e+00> : vector<1x32xf32>
    %72 = tpu.matmul %70, %71, %cst_48 {dimension_numbers = #tpu.dot_dimension_numbers<[1], [0], [0], [1], [0, 0, 1, 1], [], []>} : vector<1x256xf32>, vector<256x32xf32>, vector<1x32xf32> -> vector<1x32xf32>
    %cst_49 = arith.constant 1.562500e-02 : f32
    %73 = vector.broadcast %cst_49 : f32 to vector<1x32xf32>
    %74 = arith.mulf %72, %73 : vector<1x32xf32>
    %75 = arith.truncf %74 : vector<1x32xf32> to vector<1x32xbf16>
    %c0_50 = arith.constant 0 : index
    %c0_51 = arith.constant 0 : index
    %76 = vector.load %arg7[%c0_50, %c0_51] : memref<32x4096xbf16, #tpu.memory_space<vmem>>, vector<32x4096xbf16>
    %cst_52 = arith.constant dense<0.000000e+00> : vector<1x4096xf32>
    %77 = tpu.matmul %75, %76, %cst_52 {dimension_numbers = #tpu.dot_dimension_numbers<[1], [0], [0], [1], [0, 0, 1, 1], [], []>} : vector<1x32xbf16>, vector<32x4096xbf16>, vector<1x4096xf32> -> vector<1x4096xf32>
    %c0_53 = arith.constant 0 : index
    %c0_54 = arith.constant 0 : index
    %78 = vector.load %arg8[%c0_53, %c0_54] : memref<1x4096xf32, #tpu.memory_space<vmem>>, vector<1x4096xf32>
    %79 = arith.addf %77, %78 : vector<1x4096xf32>
    %cst_55 = arith.constant 0.000000e+00 : f32
    %80 = vector.broadcast %cst_55 : f32 to vector<1x4096xf32>
    %81 = arith.maximumf %79, %80 : vector<1x4096xf32>
    %c0_56 = arith.constant 0 : index
    %c0_57 = arith.constant 0 : index
    %82 = vector.load %arg9[%c0_56, %c0_57] : memref<1x4096xf32, #tpu.memory_space<vmem>>, vector<1x4096xf32>
    %83 = arith.mulf %81, %82 : vector<1x4096xf32>
    %cst_58 = arith.constant dense<0.000000e+00> : vector<1xf32>
    %84 = vector.multi_reduction <add>, %83, %cst_58 [1] : vector<1x4096xf32> to vector<1xf32>
    %85 = vector.shape_cast %84 : vector<1xf32> to vector<1x1xf32>
    %c0_59 = arith.constant 0 : index
    %c0_60 = arith.constant 0 : index
    %86 = vector.load %arg10[%c0_59, %c0_60] : memref<1x1xf32, #tpu.memory_space<vmem>>, vector<1x1xf32>
    %87 = arith.addf %85, %86 : vector<1x1xf32>
    %88 = vector.shape_cast %87 : vector<1x1xf32> to vector<1x1x1xf32>
    %89 = vector.shape_cast %88 : vector<1x1x1xf32> to vector<1x1x1xf32>
    %90 = vector.broadcast %89 : vector<1x1x1xf32> to vector<1x1x128xf32>
    %c0_61 = arith.constant 0 : index
    %c0_62 = arith.constant 0 : index
    %c0_63 = arith.constant 0 : index
    %91 = vector.load %arg11[%c0_61, %c0_62, %c0_63] : memref<1x1x128xf32, #tpu.memory_space<vmem>>, vector<1x1x128xf32>
    tpu.vector_store %arg11[%c0_61, %c0_62, %c0_63], %90 {strides = array<i32>} : memref<1x1x128xf32, #tpu.memory_space<vmem>>, vector<1x1x128xf32>,
    return
  }
  func.func @transform_0(%arg0: i32) -> (i32, i32, i32) {
    %c0_i32 = arith.constant 0 : i32
    %c0_i32_0 = arith.constant 0 : i32
    %c0_i32_1 = arith.constant 0 : i32
    return %arg0, %c0_i32, %c0_i32_0 : i32, i32, i32
  }
  func.func @transform_1(%arg0: i32) -> (i32, i32, i32) {
    %c0_i32 = arith.constant 0 : i32
    %c0_i32_0 = arith.constant 0 : i32
    %c0_i32_1 = arith.constant 0 : i32
    %c0_i32_2 = arith.constant 0 : i32
    return %c0_i32, %c0_i32_0, %c0_i32_1 : i32, i32, i32
  }
  func.func @transform_2(%arg0: i32) -> (i32, i32) {
    %c0_i32 = arith.constant 0 : i32
    %c0_i32_0 = arith.constant 0 : i32
    %c0_i32_1 = arith.constant 0 : i32
    return %c0_i32, %c0_i32_0 : i32, i32
  }
  func.func @transform_3(%arg0: i32) -> (i32, i32, i32) {
    %c0_i32 = arith.constant 0 : i32
    %c0_i32_0 = arith.constant 0 : i32
    %c0_i32_1 = arith.constant 0 : i32
    %c0_i32_2 = arith.constant 0 : i32
    return %c0_i32, %c0_i32_0, %c0_i32_1 : i32, i32, i32
  }
  func.func @transform_4(%arg0: i32) -> (i32, i32) {
    %c0_i32 = arith.constant 0 : i32
    %c0_i32_0 = arith.constant 0 : i32
    %c0_i32_1 = arith.constant 0 : i32
    return %c0_i32, %c0_i32_0 : i32, i32
  }
  func.func @transform_5(%arg0: i32) -> (i32, i32) {
    %c0_i32 = arith.constant 0 : i32
    %c0_i32_0 = arith.constant 0 : i32
    %c0_i32_1 = arith.constant 0 : i32
    return %c0_i32, %c0_i32_0 : i32, i32
  }
  func.func @transform_6(%arg0: i32) -> (i32, i32) {
    %c0_i32 = arith.constant 0 : i32
    %c0_i32_0 = arith.constant 0 : i32
    %c0_i32_1 = arith.constant 0 : i32
    return %c0_i32, %c0_i32_0 : i32, i32
  }
  func.func @transform_7(%arg0: i32) -> (i32, i32) {
    %c0_i32 = arith.constant 0 : i32
    %c0_i32_0 = arith.constant 0 : i32
    %c0_i32_1 = arith.constant 0 : i32
    return %c0_i32, %c0_i32_0 : i32, i32
  }
  func.func @transform_8(%arg0: i32) -> (i32, i32) {
    %c0_i32 = arith.constant 0 : i32
    %c0_i32_0 = arith.constant 0 : i32
    %c0_i32_1 = arith.constant 0 : i32
    return %c0_i32, %c0_i32_0 : i32, i32
  }
  func.func @transform_9(%arg0: i32) -> (i32, i32) {
    %c0_i32 = arith.constant 0 : i32
    %c0_i32_0 = arith.constant 0 : i32
    %c0_i32_1 = arith.constant 0 : i32
    return %c0_i32, %c0_i32_0 : i32, i32
  }
  func.func @transform_10(%arg0: i32) -> (i32, i32, i32) {
    %c0_i32 = arith.constant 0 : i32
    %c0_i32_0 = arith.constant 0 : i32
    %c0_i32_1 = arith.constant 0 : i32
    return %arg0, %c0_i32, %c0_i32_0 : i32, i32, i32
  }
}

</mosaic_0001>

<bundles_post_ra>
// kernel: custom_model_forward.1
= control target key start
LH: loop header
LB: loop body
LE: loop exit
PB: predicated region body
PF: predicated region fallthrough
CT: control target
= control target key end

     0   :  { %s6059_s15 = smov 0   ;;  %s7617_s0 = inlined_call_operand.vmem [shape: bf16[2,16,48], index: 0, kind: input, shape index: {}]   ;;  %s7618_s1 = inlined_call_operand.vmem [shape: bf16[5,48,384], index: 1, kind: input, shape index: {}]   ;;  %s7619_s2 = inlined_call_operand.vmem [shape: f32[1,384], index: 2, kind: input, shape index: {}]   ;;  %s7620_s3 = inlined_call_operand.vmem [shape: bf16[5,384,256], index: 3, kind: input, shape index: {}]   ;;  %s7621_s4 = inlined_call_operand.vmem [shape: f32[1,256], index: 4, kind: input, shape index: {}]   ;;  %s7622_s5 = inlined_call_operand.vmem [shape: f32[256,32], index: 5, kind: input, shape index: {}]   ;;  %s7623_s6 = inlined_call_operand.vmem [shape: bf16[32,4096], index: 6, kind: input, shape index: {}]   ;;  %s7624_s7 = inlined_call_operand.vmem [shape: f32[1,4096], index: 7, kind: input, shape index: {}]   ;;  %s7625_s8 = inlined_call_operand.vmem [shape: f32[1,4096], index: 8, kind: input, shape index: {}]   ;;  %s7626_s9 = inlined_call_operand.<no memory space> [shape: f32[1,1], index: 9, kind: input, shape index: {}]   ;;  %s7627_s10 = inlined_call_operand.vmem [shape: f32[2,1,128], index: 10, kind: output, shape index: {}]  }
   0x1   :  { %v15_v0 = vstv %s7626_s9 }
   0x2   :  { %16 = vst [vmem:[#allocation2] sm:$0x1] %v15_v0 }
   0x3 LB: > { %s4778_s16 = sadd.s32 4294967295, %s5996_s15   ;;  %p4782_p0 = scmp.ge.s32.totalorder %s5996_s15, 1  ;;  %s5996_s15 = sphi %s6059_s15, %s22_s15  }
   0x4   : > { %p314_p1 = scmp.lt.s32.totalorder %s5996_s15, 3 }
   0x6   : > { %p315_p2 = pnand %p4782_p0, %p314_p1 }
   0x7   : > { %v5569_v1 = vld [vmem:[%s7618_s1 + $0x4c] ss:$12 sps:$4 sm:$0xff] (!%p315_p2)   ;;  %v5998_v2 = vmov (!%p315_p2), 0.0   ;;  %v5571_v3 = vld [vmem:[%s7618_s1 + $0x50] ss:$12 sps:$4 sm:$0xff] (!%p315_p2)   ;;  %v5999_v4 = vmov (!%p315_p2), 0  }
   0x8   : > { %318 = sbr.rel (%p315_p2) target bundleno = 1503 (0x5df), region = 60  ;;  %5459 = vmatprep.subr.bf16.mxu1 (!%p315_p2), %v5998_v2  ;;  %482 = vmatprep.mubr.bf16.mxu0 (!%p315_p2), %v5999_v4  ;;  %v5572_v5 = vld [vmem:[%s7618_s1 + $0x48] ss:$12 sps:$4 sm:$0xff] (!%p315_p2)   ;;  %p350_p3 = scmp.lt.s32.totalorder (!%p315_p2), %s4778_s16, 1  ;;  %v5573_v6 = vld [vmem:[%s7618_s1 + $0x64] ss:$12 sps:$4 sm:$0xff] (!%p315_p2)  }
   0x9   : > { %450 = vmatprep.subr.bf16.mxu0 (!%p315_p2), %v5569_v1  ;;  %5568 = vset.pattern.permute.xlu0 (!%p315_p2), %v5999_v4  ;;  %vm6000_vm0 = vmmov (!%p315_p2), 0   ;;  %v5575_v7 = vld [vmem:[%s7618_s1 + $0x68] ss:$12 sps:$4 sm:$0xff] (!%p315_p2)   ;;  %v5576_v8 = vld [vmem:[%s7618_s1 + $0x60] ss:$12 sps:$4 sm:$0xff] (!%p315_p2)   ;;  %vm446_vm1 = vcmask (!%p315_p2), 392192  }
   0xa   : > { %5460 = vmatpush3.bf16.msra.mxu1 (!%p315_p2), %v5571_v3  ;;  %5465 = vmatprep.mubr.msk.bf16.mxu1 (!%p315_p2), %vm6000_vm0, %v5998_v2  ;;  %v5577_v9 = vld [vmem:[%s7618_s1 + $0x7c] ss:$12 sps:$4 sm:$0xff] (!%p315_p2)   ;;  %v5579_v10 = vld [vmem:[%s7618_s1 + $0x80] ss:$12 sps:$4 sm:$0xff] (!%p315_p2)   ;;  %v5580_v11 = vld [vmem:[%s7618_s1 + $0x78] ss:$12 sps:$4 sm:$0xff] (!%p315_p2)  }
   0xb   : > { %451 = vmatpush1.bf16.msra.mxu0 (!%p315_p2), %v5572_v5  ;;  %5461 = vmatprep.subr.bf16.mxu1 (!%p315_p2), %v5998_v2  ;;  %v5584_v12 = vld [vmem:[%s7618_s1 + $0x4] ss:$12 sps:$4 sm:$0xff] (!%p315_p2)   ;;  %v5582_v17 = vld [vmem:[%s7618_s1] ss:$12 sps:$4 sm:$0xff] (!%p315_p2)   ;;  %v5585_v18 = vld [vmem:[%s7618_s1 + $0x8] ss:$12 sps:$4 sm:$0xff] (!%p315_p2)  }
   0xc   : > { %452 = vmatprep.subr.bf16.mxu0 (!%p315_p2), %v5573_v6  ;;  %v5588_v20 = vld [vmem:[%s7618_s1 + $0x1c] ss:$12 sps:$4 sm:$0xff] (!%p315_p2)   ;;  %v5586_v21 = vld [vmem:[%s7618_s1 + $0x18] ss:$12 sps:$4 sm:$0xff] (!%p315_p2)   ;;  %v5589_v22 = vld [vmem:[%s7618_s1 + $0x20] ss:$12 sps:$4 sm:$0xff] (!%p315_p2)  }
   0xd   : > { %v5592_v23 = vld [vmem:[%s7618_s1 + $0x34] ss:$12 sps:$4 sm:$0xff] (!%p315_p2)   ;;  %v5590_v24 = vld [vmem:[%s7618_s1 + $0x30] ss:$12 sps:$4 sm:$0xff] (!%p315_p2)   ;;  %v5593_v25 = vld [vmem:[%s7618_s1 + $0x38] ss:$12 sps:$4 sm:$0xff] (!%p315_p2)  }
   0xe   : > { %5462 = vmatpush3.bf16.msra.mxu1 (!%p315_p2), %v5575_v7  ;;  %v5596_v26 = vld [vmem:[%s7618_s1 + $0x94] ss:$12 sps:$4 sm:$0xff] (!%p315_p2)   ;;  %v5594_v27 = vld [vmem:[%s7618_s1 + $0x90] ss:$12 sps:$4 sm:$0xff] (!%p315_p2)   ;;  %v5597_v28 = vld [vmem:[%s7618_s1 + $0x98] ss:$12 sps:$4 sm:$0xff] (!%p315_p2)  }
   0xf   : > { %s7629_s16 = smov (!%p350_p3, %s4778_s16), 1  ;;  %453 = vmatpush1.bf16.msra.mxu0 %v5576_v8  ;;  %5463 = vmatprep.subr.bf16.mxu1 %v5998_v2  ;;  %v5600_v29 = vld [vmem:[%s7618_s1 + $0xac] ss:$12 sps:$4 sm:$0xff]   ;;  %v5598_v30 = vld [vmem:[%s7618_s1 + $0xa8] ss:$12 sps:$4 sm:$0xff]   ;;  %vm3765_vm2 = vcmask 261120  }
  0x10   : > { %s5403_s14 = sshll.u32 %s7629_s16, 3  ;;  %454 = vmatprep.subr.bf16.mxu0 %v5577_v9  ;;  %v5601_v31 = vld [vmem:[%s7618_s1 + $0xb0] ss:$12 sps:$4 sm:$0xff]   ;;  %v5602_v33 = vld [vmem:[%s7618_s1 + $0xc0] ss:$12 sps:$4 sm:$0xff]   ;;  %vm4657_vm3 = vcmask 1040384   ;;  %s357_s25 = scalar_lea.vmem %s7627_s10, %s7629_s16 }
  0x11   : > { %s354_s9 = scalar_lea.vmem %s7617_s0, %s5403_s14  ;;  %v5604_v32 = vld [vmem:[%s7618_s1 + $0xc4] ss:$12 sps:$4 sm:$0xff]   ;;  %v5605_v34 = vld [vmem:[%s7618_s1 + $0xc8] ss:$12 sps:$4 sm:$0xff]   ;;  %v5609_v37 = vld [vmem:[%s7618_s1 + $0xe0] ss:$12 sps:$4 sm:$0xff]  }
  0x12   : > { %v6110_v13 = vld [vmem:[%s354_s9] sm:$0xff]   ;;  %5464 = vmatpush3.bf16.msra.mxu1 %v5579_v10  ;;  %v5608_v35 = vld [vmem:[%s7618_s1 + $0xdc] ss:$12 sps:$4 sm:$0xff]   ;;  %v5616_v42 = vld [vmem:[%s7618_s1 + $0x10c] ss:$12 sps:$4 sm:$0xff]  }
  0x13   : > { %v392_v14 = vshrl.u32 %v6110_v13, 16  ;;  %v394_v15 = vshll.u32 %v6110_v13, 16  ;;  %455 = vmatpush1.bf16.msra.mxu0 %v5580_v11  ;;  %5469 = vmatprep.subr.bf16.mxu1 %v5998_v2  ;;  %v5606_v36 = vld [vmem:[%s7618_s1 + $0xd8] ss:$12 sps:$4 sm:$0xff]   ;;  %v681_v38 = vrot.slane %v6110_v13, 1  ;;  %v993_v57 = vrot.slane %v6110_v13, 2 }
  0x14   : > { %584 = vmatprep.subr.bf16.mxu0 %v5584_v12  ;;  %v5612_v39 = vld [vmem:[%s7618_s1 + $0xf4] ss:$12 sps:$4 sm:$0xff]   ;;  %v5610_v40 = vld [vmem:[%s7618_s1 + $0xf0] ss:$12 sps:$4 sm:$0xff]   ;;  %v5613_v41 = vld [vmem:[%s7618_s1 + $0xf8] ss:$12 sps:$4 sm:$0xff]  }
  0x15   : > { %v396_v16 = vrot.slane %v394_v15, 1  ;;  %v5614_v43 = vld [vmem:[%s7618_s1 + $0x108] ss:$12 sps:$4 sm:$0xff]   ;;  %v5617_v44 = vld [vmem:[%s7618_s1 + $0x110] ss:$12 sps:$4 sm:$0xff]   ;;  %v836_v45 = vrot.slane %v392_v14, 1 }
  0x16   : > { %v837_v46 = vrot.slane %v394_v15, 2  ;;  %v5620_v47 = vld [vmem:[%s7618_s1 + $0x124] ss:$12 sps:$4 sm:$0xff]   ;;  %v5618_v48 = vld [vmem:[%s7618_s1 + $0x120] ss:$12 sps:$4 sm:$0xff]  }
  0x17   : > { %v397_v19 = vor.u32 %v396_v16, %v392_v14  ;;  %v5621_v49 = vld [vmem:[%s7618_s1 + $0x128] ss:$12 sps:$4 sm:$0xff]   ;;  %v5622_v52 = vld [vmem:[%s7618_s1 + $0x138] ss:$12 sps:$4 sm:$0xff]   ;;  %v5625_v53 = vld [vmem:[%s7618_s1 + $0x140] ss:$12 sps:$4 sm:$0xff]  }
  0x18   : > { %v838_v50 = vor.u32 %v837_v46, %v836_v45  ;;  %v5624_v51 = vld [vmem:[%s7618_s1 + $0x13c] ss:$12 sps:$4 sm:$0xff]   ;;  %v5628_v54 = vld [vmem:[%s7618_s1 + $0x154] ss:$12 sps:$4 sm:$0xff]   ;;  %v5629_v56 = vld [vmem:[%s7618_s1 + $0x158] ss:$12 sps:$4 sm:$0xff]  }
  0x19   : > { %4807 = vmatmul.mubr.msk.bf16.vlgmr.msra.gmra.mrb[0].mxu0 %vm446_vm1, %v397_v19  ;;  %5466 = vmatmul.mubr.msk.bf16.vlgmr.msra.gmra.mrb[0].mxu1 %vm446_vm1, %v397_v19  ;;  %v5626_v55 = vld [vmem:[%s7618_s1 + $0x150] ss:$12 sps:$4 sm:$0xff]   ;;  %v5632_v58 = vld [vmem:[%s7620_s3 + $0x184] ss:$8 sps:$4 sm:$0xff]   ;;  %v5630_v59 = vld [vmem:[%s7620_s3 + $0x180] ss:$8 sps:$4 sm:$0xff]  }
  0x1a   : > { %5470 = vmatpush3.bf16.msra.mxu1 %v5585_v18  ;;  %585 = vmatpush1.bf16.msra.mxu0 %v5582_v17  ;;  %v5633_v60 = vld [vmem:[%s7620_s3 + $0x190] ss:$8 sps:$4 sm:$0xff]   ;;  %v5635_v61 = vld [vmem:[%s7620_s3 + $0x194] ss:$8 sps:$4 sm:$0xff]   ;;  %v5636_v62 = vld [vmem:[%s7620_s3 + $0x1a0] ss:$8 sps:$4 sm:$0xff]  }
  0x1b   : > { %5471 = vmatprep.subr.bf16.mxu1 %v5998_v2  ;;  %586 = vmatprep.subr.bf16.mxu0 %v5588_v20  ;;  %v5638_v63 = vld [vmem:[%s7620_s3 + $0x1a4] ss:$8 sps:$4 sm:$0xff]   ;;  %v5641_v0 = vld [vmem:[%s7620_s3 + $0x1b4] ss:$8 sps:$4 sm:$0xff]   ;;  %v5639_v1 = vld [vmem:[%s7620_s3 + $0x1b0] ss:$8 sps:$4 sm:$0xff]  }
  0x1c   : > { %5475 = vmatprep.mubr.msk.bf16.mxu1 %vm6000_vm0, %v5998_v2  ;;  %616 = vmatprep.mubr.bf16.mxu0 %v5999_v4  ;;  %v5644_v3 = vld [vmem:[%s7620_s3 + $0x1c4] ss:$8 sps:$4 sm:$0xff]   ;;  %v5645_v5 = vld [vmem:[%s7620_s3 + $0x1d0] ss:$8 sps:$4 sm:$0xff]   ;;  %v5647_v6 = vld [vmem:[%s7620_s3 + $0x1d4] ss:$8 sps:$4 sm:$0xff]  }
  0x1d   : > { %v5650_v7 = vld [vmem:[%s7620_s3 + $0x1e4] ss:$8 sps:$4 sm:$0xff]   ;;  %v5648_v8 = vld [vmem:[%s7620_s3 + $0x1e0] ss:$8 sps:$4 sm:$0xff]   ;;  %v5651_v9 = vld [vmem:[%s7620_s3 + $0x1f0] ss:$8 sps:$4 sm:$0xff]  }
  0x1e   : > { %5472 = vmatpush3.bf16.msra.mxu1 %v5589_v22  ;;  %587 = vmatpush1.bf16.msra.mxu0 %v5586_v21  ;;  %v5653_v10 = vld [vmem:[%s7620_s3 + $0x1f4] ss:$8 sps:$4 sm:$0xff]   ;;  %v5654_v11 = vld [vmem:[%s7620_s3 + $0x280] ss:$8 sps:$4 sm:$0xff]   ;;  %v5656_v12 = vld [vmem:[%s7620_s3 + $0x284] ss:$8 sps:$4 sm:$0xff]  }
  0x1f   : > { %5473 = vmatprep.subr.bf16.mxu1 %v5998_v2  ;;  %588 = vmatprep.subr.bf16.mxu0 %v5592_v23  ;;  %v5657_v14 = vld [vmem:[%s7620_s3 + $0x200] ss:$8 sps:$4 sm:$0xff]   ;;  %v5662_v15 = vld [vmem:[%s7620_s3 + $0x294] ss:$8 sps:$4 sm:$0xff]   ;;  %v5660_v16 = vld [vmem:[%s7620_s3 + $0x290] ss:$8 sps:$4 sm:$0xff]  }
  0x20   : > { %v5665_v17 = vld [vmem:[%s7620_s3 + $0x214] ss:$8 sps:$4 sm:$0xff]   ;;  %v5663_v18 = vld [vmem:[%s7620_s3 + $0x210] ss:$8 sps:$4 sm:$0xff]   ;;  %v5668_v19 = vld [vmem:[%s7620_s3 + $0x2a4] ss:$8 sps:$4 sm:$0xff]  }
  0x21   : > { %v5666_v20 = vld [vmem:[%s7620_s3 + $0x2a0] ss:$8 sps:$4 sm:$0xff]   ;;  %v5671_v22 = vld [vmem:[%s7620_s3 + $0x224] ss:$8 sps:$4 sm:$0xff]   ;;  %v5674_v23 = vld [vmem:[%s7620_s3 + $0x2b4] ss:$8 sps:$4 sm:$0xff]  }
  0x22   : > { %5474 = vmatpush3.bf16.msra.mxu1 %v5593_v25  ;;  %589 = vmatpush1.bf16.msra.mxu0 %v5590_v24  ;;  %v5669_v21 = vld [vmem:[%s7620_s3 + $0x220] ss:$8 sps:$4 sm:$0xff]   ;;  %v5672_v24 = vld [vmem:[%s7620_s3 + $0x2b0] ss:$8 sps:$4 sm:$0xff]   ;;  %v5677_v25 = vld [vmem:[%s7620_s3 + $0x234] ss:$8 sps:$4 sm:$0xff]  }
  0x23   : > { %5479 = vmatprep.subr.bf16.mxu1 %v5998_v2  ;;  %733 = vmatprep.subr.bf16.mxu0 %v5596_v26  ;;  %v5675_v26 = vld [vmem:[%s7620_s3 + $0x230] ss:$8 sps:$4 sm:$0xff]  }
  0x25   : > { %5476 = vmatmul.mubr.msk.bf16.vlgmr.msra.gmra.mrb[4].mxu1 %vm446_vm1, %v6110_v13  ;;  %4818 = vmatmul.mubr.msk.bf16.vlgmr.msra.gmra.mrb[0].mxu0 %vm446_vm1, %v6110_v13  ;;  %v5659_v13 = vld [vmem:[%s7620_s3 + $0x204] ss:$8 sps:$4 sm:$0xff]  }
  0x26   : > { %5480 = vmatpush3.bf16.msra.mxu1 %v5597_v28  ;;  %734 = vmatpush1.bf16.msra.mxu0 %v5594_v27  ;;  %v5680_v27 = vld [vmem:[%s7620_s3 + $0x2c4] ss:$8 sps:$4 sm:$0xff]   ;;  %v5678_v28 = vld [vmem:[%s7620_s3 + $0x2c0] ss:$8 sps:$4 sm:$0xff]  }
  0x27   : > { %5481 = vmatprep.subr.bf16.mxu1 %v5998_v2  ;;  %735 = vmatprep.subr.bf16.mxu0 %v5600_v29  ;;  %v5681_v29 = vld [vmem:[%s7620_s3 + $0x240] ss:$8 sps:$4 sm:$0xff]  }
  0x28   : > { %5485 = vmatprep.mubr.msk.bf16.mxu1 %vm6000_vm0, %v5998_v2  ;;  %765 = vmatprep.mubr.bf16.mxu0 %v5999_v4 }
  0x2a   : > { %5482 = vmatpush3.bf16.msra.mxu1 %v5601_v31  ;;  %736 = vmatpush1.bf16.msra.mxu0 %v5598_v30  ;;  %v5683_v30 = vld [vmem:[%s7620_s3 + $0x244] ss:$8 sps:$4 sm:$0xff]   ;;  %v5686_v31 = vld [vmem:[%s7620_s3 + $0x2d4] ss:$8 sps:$4 sm:$0xff]  }
  0x2b   : > { %5483 = vmatprep.subr.bf16.mxu1 %v5998_v2  ;;  %737 = vmatprep.subr.bf16.mxu0 %v5604_v32  ;;  %v5684_v32 = vld [vmem:[%s7620_s3 + $0x2d0] ss:$8 sps:$4 sm:$0xff]  }
  0x2e   : > { %5484 = vmatpush3.bf16.msra.mxu1 %v5605_v34  ;;  %738 = vmatpush1.bf16.msra.mxu0 %v5602_v33  ;;  %v5689_v33 = vld [vmem:[%s7620_s3 + $0x254] ss:$8 sps:$4 sm:$0xff]   ;;  %v5687_v34 = vld [vmem:[%s7620_s3 + $0x250] ss:$8 sps:$4 sm:$0xff]  }
  0x2f   : > { %5489 = vmatprep.subr.bf16.mxu1 %v5998_v2  ;;  %890 = vmatprep.subr.bf16.mxu0 %v5608_v35  ;;  %v5692_v35 = vld [vmem:[%s7620_s3 + $0x2e4] ss:$8 sps:$4 sm:$0xff]  }
  0x31   : > { %5486 = vmatmul.mubr.msk.bf16.vlgmr.msra.gmra.mrb[8].mxu1 %vm446_vm1, %v681_v38  ;;  %4841 = vmatmul.mubr.msk.bf16.vlgmr.msra.gmra.mrb[0].mxu0 %vm446_vm1, %v681_v38  ;;  %v5693_v38 = vld [vmem:[%s7620_s3 + $0x260] ss:$8 sps:$4 sm:$0xff]  }
  0x32   : > { %5490 = vmatpush3.bf16.msra.mxu1 %v5609_v37  ;;  %891 = vmatpush1.bf16.msra.mxu0 %v5606_v36  ;;  %v5690_v36 = vld [vmem:[%s7620_s3 + $0x2e0] ss:$8 sps:$4 sm:$0xff]   ;;  %v5695_v37 = vld [vmem:[%s7620_s3 + $0x264] ss:$8 sps:$4 sm:$0xff]  }
  0x33   : > { %5491 = vmatprep.subr.bf16.mxu1 %v5998_v2  ;;  %892 = vmatprep.subr.bf16.mxu0 %v5612_v39  ;;  %v5696_v39 = vld [vmem:[%s7620_s3 + $0x2f0] ss:$8 sps:$4 sm:$0xff]  }
  0x34   : > { %5495 = vmatprep.mubr.msk.bf16.mxu1 %vm6000_vm0, %v5998_v2  ;;  %922 = vmatprep.mubr.bf16.mxu0 %v5999_v4 }
  0x36   : > { %5492 = vmatpush3.bf16.msra.mxu1 %v5613_v41  ;;  %893 = vmatpush1.bf16.msra.mxu0 %v5610_v40  ;;  %v5698_v40 = vld [vmem:[%s7620_s3 + $0x2f4] ss:$8 sps:$4 sm:$0xff]  }
  0x37   : > { %5493 = vmatprep.subr.bf16.mxu1 %v5998_v2  ;;  %894 = vmatprep.subr.bf16.mxu0 %v5616_v42  ;;  %v5701_v41 = vld [vmem:[%s7620_s3 + $0x274] ss:$8 sps:$4 sm:$0xff]   ;;  %v5704_v42 = vld [vmem:[%s7620_s3 + $0x4] ss:$8 sps:$4 sm:$0xff]  }
  0x3a   : > { %5494 = vmatpush3.bf16.msra.mxu1 %v5617_v44  ;;  %895 = vmatpush1.bf16.msra.mxu0 %v5614_v43  ;;  %v5699_v43 = vld [vmem:[%s7620_s3 + $0x270] ss:$8 sps:$4 sm:$0xff]   ;;  %v5707_v44 = vld [vmem:[%s7620_s3 + $0x104] ss:$8 sps:$4 sm:$0xff]  }
  0x3b   : > { %5499 = vmatprep.subr.bf16.mxu1 %v5998_v2  ;;  %1045 = vmatprep.subr.bf16.mxu0 %v5620_v47 }
  0x3d   : > { %5496 = vmatmul.mubr.msk.bf16.vlgmr.msra.gmra.mrb[12].mxu1 %vm446_vm1, %v838_v50  ;;  %4864 = vmatmul.mubr.msk.bf16.vlgmr.msra.gmra.mrb[0].mxu0 %vm446_vm1, %v838_v50 }
  0x3e   : > { %5500 = vmatpush3.bf16.msra.mxu1 %v5621_v49  ;;  %1046 = vmatpush1.bf16.msra.mxu0 %v5618_v48 }
  0x3f   : > { %5501 = vmatprep.subr.bf16.mxu1 %v5998_v2  ;;  %1047 = vmatprep.subr.bf16.mxu0 %v5624_v51 }
  0x40   : > { %5505 = vmatprep.mubr.msk.bf16.mxu1 %vm6000_vm0, %v5998_v2  ;;  %1077 = vmatprep.mubr.bf16.mxu0 %v5999_v4 }
  0x42   : > { %5502 = vmatpush3.bf16.msra.mxu1 %v5625_v53  ;;  %1048 = vmatpush1.bf16.msra.mxu0 %v5622_v52 }
  0x43   : > { %5503 = vmatprep.subr.bf16.mxu1 %v5998_v2  ;;  %1049 = vmatprep.subr.bf16.mxu0 %v5628_v54  ;;  %v5642_v2 = vld [vmem:[%s7620_s3 + $0x1c0] ss:$8 sps:$4 sm:$0xff]  }
  0x46   : > { %5504 = vmatpush3.bf16.msra.mxu1 %v5629_v56  ;;  %1050 = vmatpush1.bf16.msra.mxu0 %v5626_v55 }
  0x47   : > { %1531 = vmatprep.subr.bf16.mxu0 %v5632_v58  ;;  %1572 = vmatprep.subr.bf16.mxu1 %v5656_v12 }
  0x49   : > { %5506 = vmatmul.mubr.msk.bf16.vlgmr.msra.gmra.mrb[16].mxu1 %vm446_vm1, %v993_v57  ;;  %4887 = vmatmul.mubr.msk.bf16.vlgmr.msra.gmra.mrb[0].mxu0 %vm446_vm1, %v993_v57 }
  0x4a   : > { %1604 = vmatprep.mubr.bf16.mxu1 %v5999_v4  ;;  %1532 = vmatpush1.bf16.msra.mxu0 %v5630_v59 }
  0x4b   : > { %1533 = vmatprep.subr.bf16.mxu0 %v5635_v61  ;;  %1573 = vmatpush1.bf16.msra.mxu1 %v5654_v11  ;;  %v1137_v61 = vlaneseq }
  0x4c   : > { %1574 = vmatprep.subr.bf16.mxu1 %v5662_v15 }
  0x4e   : > { %1534 = vmatpush1.bf16.msra.mxu0 %v5633_v60 }
  0x4f   : > { %1535 = vmatprep.subr.bf16.mxu0 %v5638_v63  ;;  %1575 = vmatpush1.bf16.msra.mxu1 %v5660_v16 }
  0x50   : > { %1576 = vmatprep.subr.bf16.mxu1 %v5668_v19 }
  0x52   : > { %1536 = vmatpush1.bf16.msra.mxu0 %v5636_v62 }
  0x53   : > { %1537 = vmatprep.subr.bf16.mxu0 %v5641_v0  ;;  %1577 = vmatpush1.bf16.msra.mxu1 %v5666_v20 }
  0x54   : > { %1578 = vmatprep.subr.bf16.mxu1 %v5674_v23 }
  0x56   : > { %1538 = vmatpush1.bf16.msra.mxu0 %v5639_v1  ;;  %v6416_v1 = vshrl.u32 %v1137_v61, 7 }
  0x57   : > { %1539 = vmatprep.subr.bf16.mxu0 %v5644_v3  ;;  %1579 = vmatpush1.bf16.msra.mxu1 %v5672_v24 }
  0x58   : > { %1580 = vmatprep.subr.bf16.mxu1 %v5680_v27 }
  0x5a   : > { %1540 = vmatpush1.bf16.msra.mxu0 %v5642_v2 }
  0x5b   : > { %1541 = vmatprep.subr.bf16.mxu0 %v5647_v6  ;;  %1581 = vmatpush1.bf16.msra.mxu1 %v5678_v28  ;;  %v6419_v6 = vsub.s32 0, %v6416_v1 }
  0x5c   : > { %1582 = vmatprep.subr.bf16.mxu1 %v5686_v31 }
  0x5e   : > { %1542 = vmatpush1.bf16.msra.mxu0 %v5645_v5 }
  0x5f   : > { %1543 = vmatprep.subr.bf16.mxu0 %v5650_v7  ;;  %1583 = vmatpush1.bf16.msra.mxu1 %v5684_v32  ;;  %v1135_v7 = vld [vmem:[%s7619_s2] sm:$0x7] }
  0x60   : > { %1584 = vmatprep.subr.bf16.mxu1 %v5692_v35 }
  0x62   : > { %1544 = vmatpush1.bf16.msra.mxu0 %v5648_v8  ;;  %v6425_v8 = vsub.s32 1, %v6416_v1 }
  0x63   : > { %1545 = vmatprep.subr.bf16.mxu0 %v5653_v10  ;;  %1585 = vmatpush1.bf16.msra.mxu1 %v5690_v36  ;;  %v1140_v10 = vrot.slane %v1135_v7, %v6419_v6 }
  0x64   : > { %1586 = vmatprep.subr.bf16.mxu1 %v5698_v40  ;;  %v1144_v11 = vrot.slane %v1135_v7, %v6425_v8 }
  0x66   : > { %1546 = vmatpush1.bf16.msra.mxu0 %v5651_v9  ;;  %v6428_v9 = vsub.s32 2, %v6416_v1 }
  0x67   : > { %1547 = vmatprep.subr.bf16.mxu0 %v5659_v13  ;;  %1587 = vmatpush1.bf16.msra.mxu1 %v5696_v39 }
  0x68   : > { %1853 = vmatprep.subr.bf16.mxu1 %v5704_v42  ;;  %v1148_v12 = vrot.slane %v1135_v7, %v6428_v9  ;;  %v5714_v7 = vld [vmem:[%s7620_s3 + $0x20] ss:$8 sps:$4 sm:$0xff]  }
  0x6a   : > { %1548 = vmatpush1.bf16.msra.mxu0 %v5657_v14 }
  0x6b   : > { %1549 = vmatprep.subr.bf16.mxu0 %v5665_v17 }
  0x6e   : > { %1550 = vmatpush1.bf16.msra.mxu0 %v5663_v18 }
  0x6f   : > { %1551 = vmatprep.subr.bf16.mxu0 %v5671_v22 }
  0x72   : > { %1552 = vmatpush1.bf16.msra.mxu0 %v5669_v21 }
  0x73   : > { %1553 = vmatprep.subr.bf16.mxu0 %v5677_v25 }
  0x76   : > { %1554 = vmatpush1.bf16.msra.mxu0 %v5675_v26 }
  0x77   : > { %1555 = vmatprep.subr.bf16.mxu0 %v5683_v30 }
  0x7a   : > { %1556 = vmatpush1.bf16.msra.mxu0 %v5681_v29 }
  0x7b   : > { %1557 = vmatprep.subr.bf16.mxu0 %v5689_v33 }
  0x7e   : > { %1558 = vmatpush1.bf16.msra.mxu0 %v5687_v34 }
  0x7f   : > { %1559 = vmatprep.subr.bf16.mxu0 %v5695_v37 }
  0x82   : > { %1560 = vmatpush1.bf16.msra.mxu0 %v5693_v38 }
  0x83   : > { %1561 = vmatprep.subr.bf16.mxu0 %v5701_v41 }
  0x86   : > { %1562 = vmatpush1.bf16.msra.mxu0 %v5699_v43 }
  0x87   : > { %1894 = vmatprep.subr.bf16.mxu0 %v5707_v44 }
  0xec   : > { %v527_v45 = vpop.f32.mrb[0].mxu1 }
  0xed   : > { %v5467_v46 = vpop.f32.mrb[1].mxu1 }
  0xee   : > { %v530_v47 = vpop.f32.mrb[2].mxu1 }
  0xef   : > { %v5468_v48 = vpop.f32.mrb[3].mxu1 }
  0xf8   : > { %v661_v49 = vpop.f32.mrb[4].mxu1 }
  0xf9   : > { %v662_v50 = vadd.f32 %v661_v49, %v527_v45  ;;  %v5477_v51 = vpop.f32.mrb[5].mxu1 }
  0xfa   : > { %v664_v52 = vpop.f32.mrb[6].mxu1 }
  0xfb   : > { %v665_v53 = vadd.f32 %v664_v52, %v530_v47  ;;  %v5478_v54 = vpop.f32.mrb[7].mxu1  ;;  %v5702_v52 = vld [vmem:[%s7620_s3] ss:$8 sps:$4 sm:$0xff]  }
 0x104   : > { %v810_v55 = vpop.f32.mrb[8].mxu1 }
 0x105   : > { %v819_v56 = vadd.f32 %v810_v55, %v662_v50  ;;  %v5487_v57 = vpop.f32.mrb[9].mxu1 }
 0x106   : > { %v813_v58 = vpop.f32.mrb[10].mxu1  ;;  %v5705_v57 = vld [vmem:[%s7620_s3 + $0x100] ss:$8 sps:$4 sm:$0xff]  }
 0x107   : > { %v822_v59 = vadd.f32 %v813_v58, %v665_v53  ;;  %v5488_v60 = vpop.f32.mrb[11].mxu1 }
 0x110   : > { %v967_v62 = vpop.f32.mrb[12].mxu1 }
 0x111   : > { %v976_v63 = vadd.f32 %v967_v62, %v819_v56  ;;  %v5497_v0 = vpop.f32.mrb[13].mxu1  ;;  %v5713_v62 = vld [vmem:[%s7620_s3 + $0x114] ss:$8 sps:$4 sm:$0xff]  }
 0x112   : > { %v970_v2 = vpop.f32.mrb[14].mxu1  ;;  %v5708_v0 = vld [vmem:[%s7620_s3 + $0x10] ss:$8 sps:$4 sm:$0xff]  }
 0x113   : > { %v979_v3 = vadd.f32 %v970_v2, %v822_v59  ;;  %v5498_v5 = vpop.f32.mrb[15].mxu1  ;;  %v5710_v59 = vld [vmem:[%s7620_s3 + $0x14] ss:$8 sps:$4 sm:$0xff]   ;;  %v5711_v2 = vld [vmem:[%s7620_s3 + $0x110] ss:$8 sps:$4 sm:$0xff]  }
 0x114   : > { %v5719_v5 = vld [vmem:[%s7620_s3 + $0x124] ss:$8 sps:$4 sm:$0xff]  }
 0x11c   : > { %v1122_v13 = vpop.f32.mrb[16].mxu1  ;;  %v1079_v14 = vpop.f32.mrb[0].mxu0 }
 0x11d   : > { %v1131_v15 = vadd.f32 %v1122_v13, %v976_v63  ;;  %v1152_v16 = vadd.f32 %v1140_v10, %v1079_v14  ;;  %v5507_v17 = vpop.f32.mrb[17].mxu1  ;;  %v1081_v18 = vpop.f32.mrb[1].mxu0  ;;  %v5720_v13 = vld [vmem:[%s7620_s3 + $0x30] ss:$8 sps:$4 sm:$0xff]  }
 0x11e   : > { %v1153_v19 = vadd.f32 %v1144_v11, %v1081_v18  ;;  %v1125_v20 = vpop.f32.mrb[18].mxu1  ;;  %v1083_v21 = vpop.f32.mrb[2].mxu0  ;;  %v5723_v14 = vld [vmem:[%s7620_s3 + $0x130] ss:$8 sps:$4 sm:$0xff]   ;;  %v5726_v17 = vld [vmem:[%s7620_s3 + $0x40] ss:$8 sps:$4 sm:$0xff]  }
 0x11f   : > { %v1154_v22 = vadd.f32 %v1148_v12, %v1131_v15  ;;  %v1134_v23 = vadd.f32 %v1125_v20, %v979_v3  ;;  %v1155_v24 = vadd.f32 %v1140_v10, %v1083_v21  ;;  %v5508_v25 = vpop.f32.mrb[19].mxu1  ;;  %v1085_v26 = vpop.f32.mrb[3].mxu0  ;;  %v6433_v28 = vmax.f32 %v1152_v16, 0.0  ;;  %v5716_v3 = vld [vmem:[%s7620_s3 + $0x24] ss:$8 sps:$4 sm:$0xff]  }
 0x120   : > { %v1156_v27 = vadd.f32 %v1144_v11, %v1085_v26  ;;  %v1159_v31 = vmax.f32 %v1153_v19, 0.0  ;;  %v5717_v10 = vld [vmem:[%s7620_s3 + $0x120] ss:$8 sps:$4 sm:$0xff]   ;;  %v5722_v11 = vld [vmem:[%s7620_s3 + $0x34] ss:$8 sps:$4 sm:$0xff]  }
 0x121   : > { %v1157_v29 = vadd.f32 %v1148_v12, %v1134_v23  ;;  %v1161_v30 = vmax.f32 %v1155_v24, 0.0  ;;  %v6435_v33 = vmax.f32 %v1154_v22, 0.0  ;;  %v5725_v12 = vld [vmem:[%s7620_s3 + $0x134] ss:$8 sps:$4 sm:$0xff]   ;;  %v5728_v15 = vld [vmem:[%s7620_s3 + $0x44] ss:$8 sps:$4 sm:$0xff]  }
 0x122   : > { %v1162_v32 = vmax.f32 %v1156_v27, 0.0  ;;  %v1165_v61 = vpack.c.bf16 %v1159_v31, %v1159_v31  ;;  %v5731_v16 = vld [vmem:[%s7620_s3 + $0x144] ss:$8 sps:$4 sm:$0xff]   ;;  %v5729_v18 = vld [vmem:[%s7620_s3 + $0x140] ss:$8 sps:$4 sm:$0xff]  }
 0x123   : > { %v1163_v34 = vmax.f32 %v1157_v29, 0.0  ;;  %v6438_v35 = vpack.c.bf16 %v1161_v30, %v6433_v28  ;;  %v5734_v19 = vld [vmem:[%s7620_s3 + $0x54] ss:$8 sps:$4 sm:$0xff]   ;;  %v5732_v21 = vld [vmem:[%s7620_s3 + $0x50] ss:$8 sps:$4 sm:$0xff]  }
 0x124   : > { %v6440_v36 = vpack.c.bf16 %v1162_v32, %v1159_v31  ;;  %v5737_v20 = vld [vmem:[%s7620_s3 + $0x154] ss:$8 sps:$4 sm:$0xff]   ;;  %v5735_v22 = vld [vmem:[%s7620_s3 + $0x150] ss:$8 sps:$4 sm:$0xff]   ;;  %v5740_v23 = vld [vmem:[%s7620_s3 + $0x64] ss:$8 sps:$4 sm:$0xff]  }
 0x125   : > { %v6443_v37 = vpack.c.bf16 %v1163_v34, %v6435_v33  ;;  %v1270_v38 = vshll.u32 %v6438_v35, 16  ;;  %v1268_v39 = vshrl.u32 %v6438_v35, 16  ;;  %v5743_v24 = vld [vmem:[%s7620_s3 + $0x164] ss:$8 sps:$4 sm:$0xff]   ;;  %v5738_v25 = vld [vmem:[%s7620_s3 + $0x60] ss:$8 sps:$4 sm:$0xff]  }
 0x126   : > { %v1275_v40 = vshrl.u32 %v6440_v36, 16  ;;  %v1277_v41 = vshll.u32 %v6440_v36, 16  ;;  %v5741_v26 = vld [vmem:[%s7620_s3 + $0x160] ss:$8 sps:$4 sm:$0xff]   ;;  %v5746_v27 = vld [vmem:[%s7620_s3 + $0x74] ss:$8 sps:$4 sm:$0xff]  }
 0x127   : > { %v1282_v42 = vshrl.u32 %v6443_v37, 16  ;;  %v1284_v43 = vshll.u32 %v6443_v37, 16  ;;  %v1272_v44 = vrot.slane %v1270_v38, 1  ;;  %v6455_v48 = vrot.slane %v1268_v39, 1  ;;  %v5749_v29 = vld [vmem:[%s7620_s3 + $0x174] ss:$8 sps:$4 sm:$0xff]  }
 0x128   : > { %v1279_v45 = vrot.slane %v1277_v41, 1  ;;  %v6451_v46 = vrot.slane %v1275_v40, 1  ;;  %v6453_v47 = vrot.slane %v1277_v41, 2  ;;  %v6466_v55 = vrot.slane %v1270_v38, 2  ;;  %v5744_v30 = vld [vmem:[%s7620_s3 + $0x70] ss:$8 sps:$4 sm:$0xff]  }
 0x129   : > { %v1286_v49 = vrot.slane %v1284_v43, 1  ;;  %v6457_v50 = vrot.slane %v1282_v42, 1  ;;  %v6459_v51 = vrot.slane %v1284_v43, 2  ;;  %v1273_v58 = vor.u32 %v1272_v44, %v1268_v39  ;;  %v5747_v31 = vld [vmem:[%s7620_s3 + $0x170] ss:$8 sps:$4 sm:$0xff]  }
 0x12a   : > { %v1280_v53 = vor.u32 %v1279_v45, %v1275_v40  ;;  %v2371_v54 = vor.u32 %v6453_v47, %v6451_v46  ;;  %v2368_v63 = vor.u32 %v6466_v55, %v6455_v48  ;;  %v5752_v32 = vld [vmem:[%s7620_s3 + $0x84] ss:$8 sps:$4 sm:$0xff]   ;;  %v5750_v38 = vld [vmem:[%s7620_s3 + $0x80] ss:$8 sps:$4 sm:$0xff]   ;;  %v1166_v40 = vpack.c.bf16 %v6435_v33, %v6435_v33  ;;  %v5758_v41 = vld [vmem:[%s7620_s3 + $0x94] ss:$8 sps:$4 sm:$0xff]  }
 0x12b   : > { %v1287_v56 = vor.u32 %v1286_v49, %v1282_v42  ;;  %v2374_v60 = vor.u32 %v6459_v51, %v6457_v50  ;;  %v5755_v34 = vld [vmem:[%s7620_s3 + $0x304] ss:$8 sps:$4 sm:$0xff]   ;;  %v5753_v39 = vld [vmem:[%s7620_s3 + $0x300] ss:$8 sps:$4 sm:$0xff]   ;;  %v5761_v42 = vld [vmem:[%s7620_s3 + $0x314] ss:$8 sps:$4 sm:$0xff]  }
 0x12c   : > { %1563 = vmatprep.mubr.bf16.mxu0 %v1280_v53  ;;  %v1988_v43 = vrot.slane %v6440_v36, 1  ;;  %v5756_v44 = vld [vmem:[%s7620_s3 + $0x90] ss:$8 sps:$4 sm:$0xff]   ;;  %v5764_v45 = vld [vmem:[%s7620_s3 + $0xa4] ss:$8 sps:$4 sm:$0xff]  }
 0x12d   : > { %1605 = vmatmul.mubr.bf16.vlgmr.msra.gmra.mrb[20].mxu1 %v1287_v56  ;;  %1564 = vmatmul.mubr.bf16.vlgmr.msra.gmra.mrb[4].mxu0 %v1273_v58  ;;  %v5759_v33 = vld [vmem:[%s7620_s3 + $0x310] ss:$8 sps:$4 sm:$0xff]   ;;  %v5767_v49 = vld [vmem:[%s7620_s3 + $0x324] ss:$8 sps:$4 sm:$0xff]   ;;  %v5765_v53 = vld [vmem:[%s7620_s3 + $0x320] ss:$8 sps:$4 sm:$0xff]  }
 0x12e   : > { %1854 = vmatpush1.bf16.msra.mxu1 %v5702_v52  ;;  %1885 = vmatprep.mubr.bf16.mxu1 %v1165_v61  ;;  %v5762_v52 = vld [vmem:[%s7620_s3 + $0xa0] ss:$8 sps:$4 sm:$0xff]   ;;  %v5770_v56 = vld [vmem:[%s7620_s3 + $0xb4] ss:$8 sps:$4 sm:$0xff]   ;;  %v5768_v58 = vld [vmem:[%s7620_s3 + $0xb0] ss:$8 sps:$4 sm:$0xff]  }
 0x12f   : > { %1895 = vmatpush1.bf16.msra.mxu0 %v5705_v57  ;;  %1855 = vmatprep.subr.bf16.mxu1 %v5710_v59  ;;  %v5773_v57 = vld [vmem:[%s7620_s3 + $0x334] ss:$8 sps:$4 sm:$0xff]   ;;  %v5771_v59 = vld [vmem:[%s7620_s3 + $0x330] ss:$8 sps:$4 sm:$0xff]   ;;  %v5776_v61 = vld [vmem:[%s7620_s3 + $0xc4] ss:$8 sps:$4 sm:$0xff]  }
 0x130   : > { %1896 = vmatprep.subr.bf16.mxu0 %v5713_v62  ;;  %1926 = vmatprep.mubr.bf16.mxu0 %v5999_v4  ;;  %v5779_v62 = vld [vmem:[%s7620_s3 + $0x344] ss:$8 sps:$4 sm:$0xff]   ;;  %v5858_v46 = vld [vmem:[%s7620_s3 + $0x4a0] ss:$8 sps:$4 sm:$0xff]  }
 0x131   : > { %v5861_v47 = vld [vmem:[%s7620_s3 + $0x5a0] ss:$8 sps:$4 sm:$0xff]   ;;  %v5959_v48 = vld [vmem:[%s7620_s3 + $0x6a4] ss:$8 sps:$4 sm:$0xff]  }
 0x132   : > { %1856 = vmatpush1.bf16.msra.mxu1 %v5708_v0  ;;  %v5774_v0 = vld [vmem:[%s7620_s3 + $0xc0] ss:$8 sps:$4 sm:$0xff]  }
 0x133   : > { %1897 = vmatpush1.bf16.msra.mxu0 %v5711_v2  ;;  %1857 = vmatprep.subr.bf16.mxu1 %v5716_v3  ;;  %v5777_v2 = vld [vmem:[%s7620_s3 + $0x340] ss:$8 sps:$4 sm:$0xff]   ;;  %v5782_v3 = vld [vmem:[%s7620_s3 + $0xd4] ss:$8 sps:$4 sm:$0xff]  }
 0x134   : > { %1898 = vmatprep.subr.bf16.mxu0 %v5719_v5  ;;  %v5785_v5 = vld [vmem:[%s7620_s3 + $0x354] ss:$8 sps:$4 sm:$0xff]   ;;  %v5906_v50 = vld [vmem:[%s7620_s3 + $0x520] ss:$8 sps:$4 sm:$0xff]  }
 0x135   : > { %v5909_v51 = vld [vmem:[%s7620_s3 + $0x620] ss:$8 sps:$4 sm:$0xff]  }
 0x136   : > { %1858 = vmatpush1.bf16.msra.mxu1 %v5714_v7  ;;  %v5780_v7 = vld [vmem:[%s7620_s3 + $0xd0] ss:$8 sps:$4 sm:$0xff]   ;;  %v5954_v55 = vld [vmem:[%s7620_s3 + $0x720] ss:$8 sps:$4 sm:$0xff]  }
 0x137   : > { %1899 = vmatpush1.bf16.msra.mxu0 %v5717_v10  ;;  %1859 = vmatprep.subr.bf16.mxu1 %v5722_v11  ;;  %v5783_v10 = vld [vmem:[%s7620_s3 + $0x350] ss:$8 sps:$4 sm:$0xff]   ;;  %v5788_v11 = vld [vmem:[%s7620_s3 + $0xe4] ss:$8 sps:$4 sm:$0xff]  }
 0x138   : > { %1900 = vmatprep.subr.bf16.mxu0 %v5725_v12  ;;  %v5791_v12 = vld [vmem:[%s7620_s3 + $0x364] ss:$8 sps:$4 sm:$0xff]  }
 0x13a   : > { %1860 = vmatpush1.bf16.msra.mxu1 %v5720_v13  ;;  %v5786_v13 = vld [vmem:[%s7620_s3 + $0xe0] ss:$8 sps:$4 sm:$0xff]  }
 0x13b   : > { %1901 = vmatpush1.bf16.msra.mxu0 %v5723_v14  ;;  %1861 = vmatprep.subr.bf16.mxu1 %v5728_v15  ;;  %v5789_v14 = vld [vmem:[%s7620_s3 + $0x360] ss:$8 sps:$4 sm:$0xff]   ;;  %v5794_v15 = vld [vmem:[%s7620_s3 + $0xf4] ss:$8 sps:$4 sm:$0xff]  }
 0x13c   : > { %1902 = vmatprep.subr.bf16.mxu0 %v5731_v16  ;;  %v5797_v16 = vld [vmem:[%s7620_s3 + $0x374] ss:$8 sps:$4 sm:$0xff]  }
 0x13e   : > { %1862 = vmatpush1.bf16.msra.mxu1 %v5726_v17  ;;  %v5792_v17 = vld [vmem:[%s7620_s3 + $0xf0] ss:$8 sps:$4 sm:$0xff]  }
 0x13f   : > { %1903 = vmatpush1.bf16.msra.mxu0 %v5729_v18  ;;  %1863 = vmatprep.subr.bf16.mxu1 %v5734_v19  ;;  %v5795_v18 = vld [vmem:[%s7620_s3 + $0x370] ss:$8 sps:$4 sm:$0xff]   ;;  %v5800_v19 = vld [vmem:[%s7620_s3 + $0x404] ss:$8 sps:$4 sm:$0xff]  }
 0x140   : > { %1904 = vmatprep.subr.bf16.mxu0 %v5737_v20  ;;  %v5803_v20 = vld [vmem:[%s7620_s3 + $0x384] ss:$8 sps:$4 sm:$0xff]  }
 0x142   : > { %1864 = vmatpush1.bf16.msra.mxu1 %v5732_v21  ;;  %v5798_v21 = vld [vmem:[%s7620_s3 + $0x400] ss:$8 sps:$4 sm:$0xff]  }
 0x143   : > { %1905 = vmatpush1.bf16.msra.mxu0 %v5735_v22  ;;  %1865 = vmatprep.subr.bf16.mxu1 %v5740_v23  ;;  %v1164_v22 = vpack.c.bf16 %v6433_v28, %v6433_v28  ;;  %v5801_v23 = vld [vmem:[%s7620_s3 + $0x380] ss:$8 sps:$4 sm:$0xff]   ;;  %v5804_v28 = vld [vmem:[%s7620_s3 + $0x410] ss:$8 sps:$4 sm:$0xff]  }
 0x144   : > { %1906 = vmatprep.subr.bf16.mxu0 %v5743_v24  ;;  %v5806_v24 = vld [vmem:[%s7620_s3 + $0x414] ss:$8 sps:$4 sm:$0xff]  }
 0x146   : > { %1866 = vmatpush1.bf16.msra.mxu1 %v5738_v25  ;;  %v5809_v25 = vld [vmem:[%s7620_s3 + $0x394] ss:$8 sps:$4 sm:$0xff]  }
 0x147   : > { %1907 = vmatpush1.bf16.msra.mxu0 %v5741_v26  ;;  %1867 = vmatprep.subr.bf16.mxu1 %v5746_v27  ;;  %v5807_v26 = vld [vmem:[%s7620_s3 + $0x390] ss:$8 sps:$4 sm:$0xff]   ;;  %v5812_v27 = vld [vmem:[%s7620_s3 + $0x424] ss:$8 sps:$4 sm:$0xff]  }
 0x148   : > { %1908 = vmatprep.subr.bf16.mxu0 %v5749_v29  ;;  %v5815_v29 = vld [vmem:[%s7620_s3 + $0x3a4] ss:$8 sps:$4 sm:$0xff]  }
 0x14a   : > { %1868 = vmatpush1.bf16.msra.mxu1 %v5744_v30  ;;  %v5810_v30 = vld [vmem:[%s7620_s3 + $0x420] ss:$8 sps:$4 sm:$0xff]  }
 0x14b   : > { %1909 = vmatpush1.bf16.msra.mxu0 %v5747_v31  ;;  %1869 = vmatprep.subr.bf16.mxu1 %v5752_v32  ;;  %v5813_v31 = vld [vmem:[%s7620_s3 + $0x3a0] ss:$8 sps:$4 sm:$0xff]   ;;  %v5818_v32 = vld [vmem:[%s7620_s3 + $0x434] ss:$8 sps:$4 sm:$0xff]  }
 0x14c   : > { %2233 = vmatprep.subr.bf16.mxu0 %v5755_v34  ;;  %v5821_v34 = vld [vmem:[%s7620_s3 + $0x3b4] ss:$8 sps:$4 sm:$0xff]  }
 0x14e   : > { %1870 = vmatpush1.bf16.msra.mxu1 %v5750_v38  ;;  %1927 = vmatmul.mubr.bf16.vlgmr.msra.gmra.mrb[8].mxu0 %v1166_v40  ;;  %v5816_v38 = vld [vmem:[%s7620_s3 + $0x430] ss:$8 sps:$4 sm:$0xff]   ;;  %v5824_v40 = vld [vmem:[%s7620_s3 + $0x444] ss:$8 sps:$4 sm:$0xff]  }
 0x14f   : > { %2234 = vmatpush1.bf16.msra.mxu0 %v5753_v39  ;;  %2265 = vmatprep.mubr.bf16.mxu0 %v1988_v43  ;;  %v5819_v39 = vld [vmem:[%s7620_s3 + $0x3b0] ss:$8 sps:$4 sm:$0xff]   ;;  %v5825_v43 = vld [vmem:[%s7620_s3 + $0x3c0] ss:$8 sps:$4 sm:$0xff]  }
 0x150   : > { %1871 = vmatprep.subr.bf16.mxu1 %v5758_v41  ;;  %2235 = vmatprep.subr.bf16.mxu0 %v5761_v42  ;;  %v5827_v41 = vld [vmem:[%s7620_s3 + $0x3c4] ss:$8 sps:$4 sm:$0xff]   ;;  %v5822_v42 = vld [vmem:[%s7620_s3 + $0x440] ss:$8 sps:$4 sm:$0xff]  }
 0x152   : > { %1872 = vmatpush1.bf16.msra.mxu1 %v5756_v44  ;;  %v5830_v44 = vld [vmem:[%s7620_s3 + $0x454] ss:$8 sps:$4 sm:$0xff]  }
 0x153   : > { %2236 = vmatpush1.bf16.msra.mxu0 %v5759_v33  ;;  %1873 = vmatprep.subr.bf16.mxu1 %v5764_v45  ;;  %v5833_v33 = vld [vmem:[%s7620_s3 + $0x3d4] ss:$8 sps:$4 sm:$0xff]   ;;  %v5828_v45 = vld [vmem:[%s7620_s3 + $0x450] ss:$8 sps:$4 sm:$0xff]  }
 0x154   : > { %2237 = vmatprep.subr.bf16.mxu0 %v5767_v49  ;;  %v5831_v49 = vld [vmem:[%s7620_s3 + $0x3d0] ss:$8 sps:$4 sm:$0xff]  }
 0x156   : > { %1874 = vmatpush1.bf16.msra.mxu1 %v5762_v52  ;;  %v5836_v52 = vld [vmem:[%s7620_s3 + $0x464] ss:$8 sps:$4 sm:$0xff]  }
 0x157   : > { %2238 = vmatpush1.bf16.msra.mxu0 %v5765_v53  ;;  %1875 = vmatprep.subr.bf16.mxu1 %v5770_v56  ;;  %v5839_v53 = vld [vmem:[%s7620_s3 + $0x3e4] ss:$8 sps:$4 sm:$0xff]   ;;  %v5834_v56 = vld [vmem:[%s7620_s3 + $0x460] ss:$8 sps:$4 sm:$0xff]  }
 0x158   : > { %2239 = vmatprep.subr.bf16.mxu0 %v5773_v57  ;;  %v5837_v57 = vld [vmem:[%s7620_s3 + $0x3e0] ss:$8 sps:$4 sm:$0xff]  }
 0x15a   : > { %1876 = vmatpush1.bf16.msra.mxu1 %v5768_v58  ;;  %v5842_v58 = vld [vmem:[%s7620_s3 + $0x474] ss:$8 sps:$4 sm:$0xff]  }
 0x15b   : > { %2240 = vmatpush1.bf16.msra.mxu0 %v5771_v59  ;;  %1877 = vmatprep.subr.bf16.mxu1 %v5776_v61  ;;  %v5845_v59 = vld [vmem:[%s7620_s3 + $0x3f4] ss:$8 sps:$4 sm:$0xff]   ;;  %v5840_v61 = vld [vmem:[%s7620_s3 + $0x470] ss:$8 sps:$4 sm:$0xff]  }
 0x15c   : > { %2241 = vmatprep.subr.bf16.mxu0 %v5779_v62  ;;  %v5843_v62 = vld [vmem:[%s7620_s3 + $0x3f0] ss:$8 sps:$4 sm:$0xff]  }
 0x15e   : > { %1878 = vmatpush1.bf16.msra.mxu1 %v5774_v0  ;;  %v5848_v0 = vld [vmem:[%s7620_s3 + $0x484] ss:$8 sps:$4 sm:$0xff]  }
 0x15f   : > { %2242 = vmatpush1.bf16.msra.mxu0 %v5777_v2  ;;  %1879 = vmatprep.subr.bf16.mxu1 %v5782_v3  ;;  %v5851_v2 = vld [vmem:[%s7620_s3 + $0x584] ss:$8 sps:$4 sm:$0xff]   ;;  %v5846_v3 = vld [vmem:[%s7620_s3 + $0x480] ss:$8 sps:$4 sm:$0xff]  }
 0x160   : > { %2243 = vmatprep.subr.bf16.mxu0 %v5785_v5  ;;  %v1989_v5 = vrot.slane %v6443_v37, 1 }
 0x162   : > { %1880 = vmatpush1.bf16.msra.mxu1 %v5780_v7  ;;  %v5849_v7 = vld [vmem:[%s7620_s3 + $0x580] ss:$8 sps:$4 sm:$0xff]  }
 0x163   : > { %2244 = vmatpush1.bf16.msra.mxu0 %v5783_v10  ;;  %1881 = vmatprep.subr.bf16.mxu1 %v5788_v11  ;;  %v1987_v10 = vrot.slane %v6438_v35, 1  ;;  %v5854_v11 = vld [vmem:[%s7620_s3 + $0x494] ss:$8 sps:$4 sm:$0xff]  }
 0x164   : > { %2245 = vmatprep.subr.bf16.mxu0 %v5791_v12  ;;  %v5857_v12 = vld [vmem:[%s7620_s3 + $0x594] ss:$8 sps:$4 sm:$0xff]  }
 0x166   : > { %1882 = vmatpush1.bf16.msra.mxu1 %v5786_v13  ;;  %v5852_v13 = vld [vmem:[%s7620_s3 + $0x490] ss:$8 sps:$4 sm:$0xff]  }
 0x167   : > { %2246 = vmatpush1.bf16.msra.mxu0 %v5789_v14  ;;  %1883 = vmatprep.subr.bf16.mxu1 %v5794_v15  ;;  %v5855_v14 = vld [vmem:[%s7620_s3 + $0x590] ss:$8 sps:$4 sm:$0xff]   ;;  %v5860_v15 = vld [vmem:[%s7620_s3 + $0x4a4] ss:$8 sps:$4 sm:$0xff]  }
 0x168   : > { %2247 = vmatprep.subr.bf16.mxu0 %v5797_v16  ;;  %v5863_v16 = vld [vmem:[%s7620_s3 + $0x5a4] ss:$8 sps:$4 sm:$0xff]  }
 0x16a   : > { %1884 = vmatpush1.bf16.msra.mxu1 %v5792_v17  ;;  %v5869_v17 = vld [vmem:[%s7620_s3 + $0x5b4] ss:$8 sps:$4 sm:$0xff]  }
 0x16b   : > { %2248 = vmatpush1.bf16.msra.mxu0 %v5795_v18  ;;  %2274 = vmatprep.subr.bf16.mxu1 %v5800_v19  ;;  %v5864_v18 = vld [vmem:[%s7620_s3 + $0x4b0] ss:$8 sps:$4 sm:$0xff]  }
 0x16c   : > { %2249 = vmatprep.subr.bf16.mxu0 %v5803_v20  ;;  %v5867_v19 = vld [vmem:[%s7620_s3 + $0x5b0] ss:$8 sps:$4 sm:$0xff]   ;;  %v5872_v20 = vld [vmem:[%s7620_s3 + $0x4c4] ss:$8 sps:$4 sm:$0xff]  }
 0x16d   : > { %1886 = vmatmul.mubr.bf16.vlgmr.msra.gmra.mrb[24].mxu1 %v1164_v22  ;;  %v5870_v22 = vld [vmem:[%s7620_s3 + $0x4c0] ss:$8 sps:$4 sm:$0xff]  }
 0x16e   : > { %2275 = vmatpush1.bf16.msra.mxu1 %v5798_v21  ;;  %2306 = vmatprep.mubr.bf16.mxu1 %v5999_v4  ;;  %v5875_v21 = vld [vmem:[%s7620_s3 + $0x5c4] ss:$8 sps:$4 sm:$0xff]  }
 0x16f   : > { %2250 = vmatpush1.bf16.msra.mxu0 %v5801_v23  ;;  %2276 = vmatprep.subr.bf16.mxu1 %v5806_v24  ;;  %v5873_v23 = vld [vmem:[%s7620_s3 + $0x5c0] ss:$8 sps:$4 sm:$0xff]   ;;  %v5878_v24 = vld [vmem:[%s7620_s3 + $0x4d4] ss:$8 sps:$4 sm:$0xff]  }
 0x170   : > { %2251 = vmatprep.subr.bf16.mxu0 %v5809_v25  ;;  %v5881_v25 = vld [vmem:[%s7620_s3 + $0x5d4] ss:$8 sps:$4 sm:$0xff]  }
 0x172   : > { %2277 = vmatpush1.bf16.msra.mxu1 %v5804_v28  ;;  %v5876_v28 = vld [vmem:[%s7620_s3 + $0x4d0] ss:$8 sps:$4 sm:$0xff]  }
 0x173   : > { %2252 = vmatpush1.bf16.msra.mxu0 %v5807_v26  ;;  %2278 = vmatprep.subr.bf16.mxu1 %v5812_v27  ;;  %v5879_v26 = vld [vmem:[%s7620_s3 + $0x5d0] ss:$8 sps:$4 sm:$0xff]   ;;  %v5884_v27 = vld [vmem:[%s7620_s3 + $0x4e4] ss:$8 sps:$4 sm:$0xff]  }
 0x174   : > { %2253 = vmatprep.subr.bf16.mxu0 %v5815_v29  ;;  %v5887_v29 = vld [vmem:[%s7620_s3 + $0x5e4] ss:$8 sps:$4 sm:$0xff]  }
 0x176   : > { %2279 = vmatpush1.bf16.msra.mxu1 %v5810_v30  ;;  %v5882_v30 = vld [vmem:[%s7620_s3 + $0x4e0] ss:$8 sps:$4 sm:$0xff]  }
 0x177   : > { %2254 = vmatpush1.bf16.msra.mxu0 %v5813_v31  ;;  %2280 = vmatprep.subr.bf16.mxu1 %v5818_v32  ;;  %v5885_v31 = vld [vmem:[%s7620_s3 + $0x5e0] ss:$8 sps:$4 sm:$0xff]   ;;  %v5890_v32 = vld [vmem:[%s7620_s3 + $0x4f4] ss:$8 sps:$4 sm:$0xff]  }
 0x178   : > { %2255 = vmatprep.subr.bf16.mxu0 %v5821_v34  ;;  %v5893_v34 = vld [vmem:[%s7620_s3 + $0x5f4] ss:$8 sps:$4 sm:$0xff]  }
 0x17a   : > { %2281 = vmatpush1.bf16.msra.mxu1 %v5816_v38  ;;  %v5888_v38 = vld [vmem:[%s7620_s3 + $0x4f0] ss:$8 sps:$4 sm:$0xff]  }
 0x17b   : > { %2256 = vmatpush1.bf16.msra.mxu0 %v5819_v39  ;;  %2282 = vmatprep.subr.bf16.mxu1 %v5824_v40  ;;  %v5891_v39 = vld [vmem:[%s7620_s3 + $0x5f0] ss:$8 sps:$4 sm:$0xff]   ;;  %v5896_v40 = vld [vmem:[%s7620_s3 + $0x504] ss:$8 sps:$4 sm:$0xff]  }
 0x17c   : > { %2257 = vmatprep.subr.bf16.mxu0 %v5827_v41  ;;  %v5899_v41 = vld [vmem:[%s7620_s3 + $0x604] ss:$8 sps:$4 sm:$0xff]  }
 0x17e   : > { %2283 = vmatpush1.bf16.msra.mxu1 %v5822_v42  ;;  %v5894_v42 = vld [vmem:[%s7620_s3 + $0x500] ss:$8 sps:$4 sm:$0xff]  }
 0x17f   : > { %2258 = vmatpush1.bf16.msra.mxu0 %v5825_v43  ;;  %2284 = vmatprep.subr.bf16.mxu1 %v5830_v44  ;;  %v5897_v43 = vld [vmem:[%s7620_s3 + $0x600] ss:$8 sps:$4 sm:$0xff]   ;;  %v5902_v44 = vld [vmem:[%s7620_s3 + $0x514] ss:$8 sps:$4 sm:$0xff]  }
 0x180   : > { %2259 = vmatprep.subr.bf16.mxu0 %v5833_v33  ;;  %v5905_v33 = vld [vmem:[%s7620_s3 + $0x614] ss:$8 sps:$4 sm:$0xff]  }
 0x182   : > { %2285 = vmatpush1.bf16.msra.mxu1 %v5828_v45  ;;  %v2752_v45 = vrot.slane %v6440_v36, 2  ;;  %v5911_v36 = vld [vmem:[%s7620_s3 + $0x624] ss:$8 sps:$4 sm:$0xff]  }
 0x183   : > { %2260 = vmatpush1.bf16.msra.mxu0 %v5831_v49  ;;  %2286 = vmatprep.subr.bf16.mxu1 %v5836_v52  ;;  %v5900_v49 = vld [vmem:[%s7620_s3 + $0x510] ss:$8 sps:$4 sm:$0xff]  }
 0x184   : > { %2261 = vmatprep.subr.bf16.mxu0 %v5839_v53  ;;  %v5903_v52 = vld [vmem:[%s7620_s3 + $0x610] ss:$8 sps:$4 sm:$0xff]   ;;  %v5908_v53 = vld [vmem:[%s7620_s3 + $0x524] ss:$8 sps:$4 sm:$0xff]  }
 0x186   : > { %2287 = vmatpush1.bf16.msra.mxu1 %v5834_v56  ;;  %v5917_v56 = vld [vmem:[%s7620_s3 + $0x634] ss:$8 sps:$4 sm:$0xff]  }
 0x187   : > { %2262 = vmatpush1.bf16.msra.mxu0 %v5837_v57  ;;  %2288 = vmatprep.subr.bf16.mxu1 %v5842_v58  ;;  %v5912_v57 = vld [vmem:[%s7620_s3 + $0x530] ss:$8 sps:$4 sm:$0xff]  }
 0x188   : > { %2263 = vmatprep.subr.bf16.mxu0 %v5845_v59  ;;  %v5915_v58 = vld [vmem:[%s7620_s3 + $0x630] ss:$8 sps:$4 sm:$0xff]   ;;  %v5920_v59 = vld [vmem:[%s7620_s3 + $0x544] ss:$8 sps:$4 sm:$0xff]  }
 0x18a   : > { %2289 = vmatpush1.bf16.msra.mxu1 %v5840_v61  ;;  %v5923_v61 = vld [vmem:[%s7620_s3 + $0x644] ss:$8 sps:$4 sm:$0xff]  }
 0x18b   : > { %2264 = vmatpush1.bf16.msra.mxu0 %v5843_v62  ;;  %2618 = vmatprep.subr.bf16.mxu1 %v5848_v0  ;;  %v5918_v62 = vld [vmem:[%s7620_s3 + $0x540] ss:$8 sps:$4 sm:$0xff]  }
 0x18c   : > { %2659 = vmatprep.subr.bf16.mxu0 %v5851_v2  ;;  %v5921_v0 = vld [vmem:[%s7620_s3 + $0x640] ss:$8 sps:$4 sm:$0xff]   ;;  %v5926_v2 = vld [vmem:[%s7620_s3 + $0x554] ss:$8 sps:$4 sm:$0xff]  }
 0x18d   : > { %2307 = vmatmul.mubr.bf16.vlgmr.msra.gmra.mrb[28].mxu1 %v1989_v5  ;;  %v5924_v5 = vld [vmem:[%s7620_s3 + $0x550] ss:$8 sps:$4 sm:$0xff]  }
 0x18e   : > { %2266 = vmatmul.mubr.bf16.vlgmr.msra.gmra.mrb[12].mxu0 %v1987_v10  ;;  %2619 = vmatpush1.bf16.msra.mxu1 %v5846_v3  ;;  %v5929_v3 = vld [vmem:[%s7620_s3 + $0x654] ss:$8 sps:$4 sm:$0xff]   ;;  %v5932_v10 = vld [vmem:[%s7620_s3 + $0x564] ss:$8 sps:$4 sm:$0xff]  }
 0x18f   : > { %2650 = vmatprep.mubr.bf16.mxu1 %v2371_v54  ;;  %2660 = vmatpush1.bf16.msra.mxu0 %v5849_v7  ;;  %v5866_v54 = vld [vmem:[%s7620_s3 + $0x4b4] ss:$8 sps:$4 sm:$0xff]   ;;  %v5927_v7 = vld [vmem:[%s7620_s3 + $0x650] ss:$8 sps:$4 sm:$0xff]  }
 0x190   : > { %2620 = vmatprep.subr.bf16.mxu1 %v5854_v11  ;;  %2661 = vmatprep.subr.bf16.mxu0 %v5857_v12  ;;  %v5935_v11 = vld [vmem:[%s7620_s3 + $0x664] ss:$8 sps:$4 sm:$0xff]   ;;  %v5930_v12 = vld [vmem:[%s7620_s3 + $0x560] ss:$8 sps:$4 sm:$0xff]  }
 0x191   : > { %2691 = vmatprep.mubr.bf16.mxu0 %v5999_v4 }
 0x192   : > { %2621 = vmatpush1.bf16.msra.mxu1 %v5852_v13  ;;  %v5933_v13 = vld [vmem:[%s7620_s3 + $0x660] ss:$8 sps:$4 sm:$0xff]  }
 0x193   : > { %2662 = vmatpush1.bf16.msra.mxu0 %v5855_v14  ;;  %2622 = vmatprep.subr.bf16.mxu1 %v5860_v15  ;;  %v5938_v14 = vld [vmem:[%s7620_s3 + $0x574] ss:$8 sps:$4 sm:$0xff]  }
 0x194   : > { %2663 = vmatprep.subr.bf16.mxu0 %v5863_v16  ;;  %v5941_v15 = vld [vmem:[%s7620_s3 + $0x674] ss:$8 sps:$4 sm:$0xff]   ;;  %v5936_v16 = vld [vmem:[%s7620_s3 + $0x570] ss:$8 sps:$4 sm:$0xff]  }
 0x196   : > { %2623 = vmatpush1.bf16.msra.mxu1 %v5858_v46  ;;  %v5939_v46 = vld [vmem:[%s7620_s3 + $0x670] ss:$8 sps:$4 sm:$0xff]  }
 0x197   : > { %2664 = vmatpush1.bf16.msra.mxu0 %v5861_v47  ;;  %2624 = vmatprep.subr.bf16.mxu1 %v5866_v54  ;;  %v5944_v47 = vld [vmem:[%s7620_s3 + $0x704] ss:$8 sps:$4 sm:$0xff]  }
 0x198   : > { %2665 = vmatprep.subr.bf16.mxu0 %v5869_v17  ;;  %v5947_v54 = vld [vmem:[%s7620_s3 + $0x684] ss:$8 sps:$4 sm:$0xff]   ;;  %v5942_v17 = vld [vmem:[%s7620_s3 + $0x700] ss:$8 sps:$4 sm:$0xff]  }
 0x19a   : > { %2625 = vmatpush1.bf16.msra.mxu1 %v5864_v18  ;;  %v5945_v18 = vld [vmem:[%s7620_s3 + $0x680] ss:$8 sps:$4 sm:$0xff]  }
 0x19b   : > { %2666 = vmatpush1.bf16.msra.mxu0 %v5867_v19  ;;  %2626 = vmatprep.subr.bf16.mxu1 %v5872_v20  ;;  %v5950_v19 = vld [vmem:[%s7620_s3 + $0x714] ss:$8 sps:$4 sm:$0xff]  }
 0x19c   : > { %2667 = vmatprep.subr.bf16.mxu0 %v5875_v21  ;;  %v5953_v20 = vld [vmem:[%s7620_s3 + $0x694] ss:$8 sps:$4 sm:$0xff]   ;;  %v5948_v21 = vld [vmem:[%s7620_s3 + $0x710] ss:$8 sps:$4 sm:$0xff]  }
 0x19e   : > { %2627 = vmatpush1.bf16.msra.mxu1 %v5870_v22  ;;  %v5951_v22 = vld [vmem:[%s7620_s3 + $0x690] ss:$8 sps:$4 sm:$0xff]  }
 0x19f   : > { %2668 = vmatpush1.bf16.msra.mxu0 %v5873_v23  ;;  %2628 = vmatprep.subr.bf16.mxu1 %v5878_v24  ;;  %v5956_v23 = vld [vmem:[%s7620_s3 + $0x724] ss:$8 sps:$4 sm:$0xff]   ;;  %v5962_v24 = vld [vmem:[%s7620_s3 + $0x734] ss:$8 sps:$4 sm:$0xff]  }
 0x1a0   : > { %2669 = vmatprep.subr.bf16.mxu0 %v5881_v25  ;;  %v5965_v25 = vld [vmem:[%s7620_s3 + $0x6b4] ss:$8 sps:$4 sm:$0xff]  }
 0x1a2   : > { %2629 = vmatpush1.bf16.msra.mxu1 %v5876_v28  ;;  %v5960_v28 = vld [vmem:[%s7620_s3 + $0x730] ss:$8 sps:$4 sm:$0xff]  }
 0x1a3   : > { %2670 = vmatpush1.bf16.msra.mxu0 %v5879_v26  ;;  %2630 = vmatprep.subr.bf16.mxu1 %v5884_v27  ;;  %v5963_v26 = vld [vmem:[%s7620_s3 + $0x6b0] ss:$8 sps:$4 sm:$0xff]   ;;  %v5968_v27 = vld [vmem:[%s7620_s3 + $0x744] ss:$8 sps:$4 sm:$0xff]  }
 0x1a4   : > { %2671 = vmatprep.subr.bf16.mxu0 %v5887_v29  ;;  %v5971_v29 = vld [vmem:[%s7620_s3 + $0x6c4] ss:$8 sps:$4 sm:$0xff]  }
 0x1a6   : > { %2631 = vmatpush1.bf16.msra.mxu1 %v5882_v30  ;;  %v5966_v30 = vld [vmem:[%s7620_s3 + $0x740] ss:$8 sps:$4 sm:$0xff]  }
 0x1a7   : > { %2672 = vmatpush1.bf16.msra.mxu0 %v5885_v31  ;;  %2632 = vmatprep.subr.bf16.mxu1 %v5890_v32  ;;  %v5969_v31 = vld [vmem:[%s7620_s3 + $0x6c0] ss:$8 sps:$4 sm:$0xff]   ;;  %v5974_v32 = vld [vmem:[%s7620_s3 + $0x754] ss:$8 sps:$4 sm:$0xff]  }
 0x1a8   : > { %2673 = vmatprep.subr.bf16.mxu0 %v5893_v34  ;;  %v5977_v34 = vld [vmem:[%s7620_s3 + $0x6d4] ss:$8 sps:$4 sm:$0xff]  }
 0x1aa   : > { %2633 = vmatpush1.bf16.msra.mxu1 %v5888_v38  ;;  %v5972_v38 = vld [vmem:[%s7620_s3 + $0x750] ss:$8 sps:$4 sm:$0xff]  }
 0x1ab   : > { %2674 = vmatpush1.bf16.msra.mxu0 %v5891_v39  ;;  %2634 = vmatprep.subr.bf16.mxu1 %v5896_v40  ;;  %v5975_v39 = vld [vmem:[%s7620_s3 + $0x6d0] ss:$8 sps:$4 sm:$0xff]   ;;  %v5980_v40 = vld [vmem:[%s7620_s3 + $0x764] ss:$8 sps:$4 sm:$0xff]  }
 0x1ac   : > { %2997 = vmatprep.subr.bf16.mxu0 %v5899_v41  ;;  %v5983_v41 = vld [vmem:[%s7620_s3 + $0x6e4] ss:$8 sps:$4 sm:$0xff]  }
 0x1ae   : > { %2635 = vmatpush1.bf16.msra.mxu1 %v5894_v42  ;;  %2692 = vmatmul.mubr.bf16.vlgmr.msra.gmra.mrb[16].mxu0 %v2374_v60  ;;  %v5914_v60 = vld [vmem:[%s7620_s3 + $0x534] ss:$8 sps:$4 sm:$0xff]   ;;  %v5978_v42 = vld [vmem:[%s7620_s3 + $0x760] ss:$8 sps:$4 sm:$0xff]  }
 0x1af   : > { %2998 = vmatpush1.bf16.msra.mxu0 %v5897_v43  ;;  %3029 = vmatprep.mubr.bf16.mxu0 %v2752_v45  ;;  %v5981_v43 = vld [vmem:[%s7620_s3 + $0x6e0] ss:$8 sps:$4 sm:$0xff]   ;;  %v5984_v45 = vld [vmem:[%s7620_s3 + $0x770] ss:$8 sps:$4 sm:$0xff]  }
 0x1b0   : > { %2636 = vmatprep.subr.bf16.mxu1 %v5902_v44  ;;  %2999 = vmatprep.subr.bf16.mxu0 %v5905_v33  ;;  %v5986_v44 = vld [vmem:[%s7620_s3 + $0x774] ss:$8 sps:$4 sm:$0xff]  }
 0x1b1   : > { %v5989_v33 = vld [vmem:[%s7620_s3 + $0x6f4] ss:$8 sps:$4 sm:$0xff]  }
 0x1b2   : > { %2637 = vmatpush1.bf16.msra.mxu1 %v5900_v49  ;;  %v5987_v49 = vld [vmem:[%s7620_s3 + $0x6f0] ss:$8 sps:$4 sm:$0xff]  }
 0x1b3   : > { %3000 = vmatpush1.bf16.msra.mxu0 %v5903_v52  ;;  %2638 = vmatprep.subr.bf16.mxu1 %v5908_v53  ;;  %v2753_v52 = vrot.slane %v6443_v37, 2  ;;  %v2751_v53 = vrot.slane %v6438_v35, 2  ;;  %v3125_v35 = vld [vmem:[%s7622_s5 + $0x80] sm:$0xff] }
 0x1b4   : > { %3001 = vmatprep.subr.bf16.mxu0 %v5911_v36 }
 0x1b6   : > { %2639 = vmatpush1.bf16.msra.mxu1 %v5906_v50 }
 0x1b7   : > { %3002 = vmatpush1.bf16.msra.mxu0 %v5909_v51  ;;  %2640 = vmatprep.subr.bf16.mxu1 %v5914_v60 }
 0x1b8   : > { %3003 = vmatprep.subr.bf16.mxu0 %v5917_v56 }
 0x1ba   : > { %2641 = vmatpush1.bf16.msra.mxu1 %v5912_v57 }
 0x1bb   : > { %3004 = vmatpush1.bf16.msra.mxu0 %v5915_v58  ;;  %2642 = vmatprep.subr.bf16.mxu1 %v5920_v59 }
 0x1bc   : > { %3005 = vmatprep.subr.bf16.mxu0 %v5923_v61 }
 0x1be   : > { %2643 = vmatpush1.bf16.msra.mxu1 %v5918_v62 }
 0x1bf   : > { %3006 = vmatpush1.bf16.msra.mxu0 %v5921_v0  ;;  %2644 = vmatprep.subr.bf16.mxu1 %v5926_v2 }
 0x1c0   : > { %3007 = vmatprep.subr.bf16.mxu0 %v5929_v3 }
 0x1c2   : > { %2645 = vmatpush1.bf16.msra.mxu1 %v5924_v5  ;;  %v3126_v5 = vld [vmem:[%s7622_s5 + $0x88] sm:$0xff] }
 0x1c3   : > { %3008 = vmatpush1.bf16.msra.mxu0 %v5927_v7  ;;  %2646 = vmatprep.subr.bf16.mxu1 %v5932_v10  ;;  %v3109_v7 = vld [vmem:[%s7622_s5] sm:$0xff]  ;;  %v5509_v10 = vpack.c.bf16 %v3126_v5, %v3125_v35 }
 0x1c4   : > { %3009 = vmatprep.subr.bf16.mxu0 %v5935_v11  ;;  %v3110_v11 = vld [vmem:[%s7622_s5 + $0x8] sm:$0xff] }
 0x1c6   : > { %2647 = vmatpush1.bf16.msra.mxu1 %v5930_v12  ;;  %v3127_v12 = vld [vmem:[%s7622_s5 + $0x90] sm:$0xff] }
 0x1c7   : > { %3010 = vmatpush1.bf16.msra.mxu0 %v5933_v13  ;;  %2648 = vmatprep.subr.bf16.mxu1 %v5938_v14  ;;  %v3128_v13 = vld [vmem:[%s7622_s5 + $0x98] sm:$0xff]  ;;  %v5511_v14 = vpack.c.bf16 %v3110_v11, %v3109_v7 }
 0x1c8   : > { %3011 = vmatprep.subr.bf16.mxu0 %v5941_v15  ;;  %v5513_v15 = vpack.c.bf16 %v3128_v13, %v3127_v12 }
 0x1ca   : > { %2649 = vmatpush1.bf16.msra.mxu1 %v5936_v16  ;;  %v3111_v16 = vld [vmem:[%s7622_s5 + $0x10] sm:$0xff] }
 0x1cb   : > { %3012 = vmatpush1.bf16.msra.mxu0 %v5939_v46  ;;  %3038 = vmatprep.subr.bf16.mxu1 %v5944_v47  ;;  %v3112_v46 = vld [vmem:[%s7622_s5 + $0x18] sm:$0xff] }
 0x1cc   : > { %3013 = vmatprep.subr.bf16.mxu0 %v5947_v54  ;;  %v5515_v47 = vpack.c.bf16 %v3112_v46, %v3111_v16 }
 0x1cd   : > { %2651 = vmatmul.mubr.bf16.vlgmr.msra.gmra.mrb[32].mxu1 %v2368_v63  ;;  %v5957_v63 = vld [vmem:[%s7620_s3 + $0x6a0] ss:$8 sps:$4 sm:$0xff]  }
 0x1ce   : > { %3039 = vmatpush1.bf16.msra.mxu1 %v5942_v17  ;;  %3070 = vmatprep.mubr.bf16.mxu1 %v5999_v4  ;;  %v3129_v17 = vld [vmem:[%s7622_s5 + $0xa0] sm:$0xff] }
 0x1cf   : > { %3014 = vmatpush1.bf16.msra.mxu0 %v5945_v18  ;;  %3040 = vmatprep.subr.bf16.mxu1 %v5950_v19  ;;  %v3130_v18 = vld [vmem:[%s7622_s5 + $0xa8] sm:$0xff] }
 0x1d0   : > { %3015 = vmatprep.subr.bf16.mxu0 %v5953_v20 }
 0x1d2   : > { %3041 = vmatpush1.bf16.msra.mxu1 %v5948_v21  ;;  %v5517_v21 = vpack.c.bf16 %v3130_v18, %v3129_v17 }
 0x1d3   : > { %3016 = vmatpush1.bf16.msra.mxu0 %v5951_v22  ;;  %3042 = vmatprep.subr.bf16.mxu1 %v5956_v23 }
 0x1d4   : > { %3017 = vmatprep.subr.bf16.mxu0 %v5959_v48  ;;  %v3113_v48 = vld [vmem:[%s7622_s5 + $0x20] sm:$0xff] }
 0x1d6   : > { %3043 = vmatpush1.bf16.msra.mxu1 %v5954_v55  ;;  %v3114_v55 = vld [vmem:[%s7622_s5 + $0x28] sm:$0xff] }
 0x1d7   : > { %3018 = vmatpush1.bf16.msra.mxu0 %v5957_v63  ;;  %3044 = vmatprep.subr.bf16.mxu1 %v5962_v24 }
 0x1d8   : > { %3019 = vmatprep.subr.bf16.mxu0 %v5965_v25  ;;  %v5519_v25 = vpack.c.bf16 %v3114_v55, %v3113_v48  ;;  %v3081_v55 = vld [vmem:[%s7621_s4] sm:$0x3] }
 0x1da   : > { %3045 = vmatpush1.bf16.msra.mxu1 %v5960_v28 }
 0x1db   : > { %3020 = vmatpush1.bf16.msra.mxu0 %v5963_v26  ;;  %3046 = vmatprep.subr.bf16.mxu1 %v5968_v27  ;;  %v3131_v26 = vld [vmem:[%s7622_s5 + $0xb0] sm:$0xff]  ;;  %v3132_v27 = vld [vmem:[%s7622_s5 + $0xb8] sm:$0xff] }
 0x1dc   : > { %3021 = vmatprep.subr.bf16.mxu0 %v5971_v29  ;;  %v5521_v29 = vpack.c.bf16 %v3132_v27, %v3131_v26  ;;  %v3086_v26 = vrot.slane %v3081_v55, %v6419_v6 }
 0x1de   : > { %3047 = vmatpush1.bf16.msra.mxu1 %v5966_v30  ;;  %v3115_v30 = vld [vmem:[%s7622_s5 + $0x30] sm:$0xff] }
 0x1df   : > { %3022 = vmatpush1.bf16.msra.mxu0 %v5969_v31  ;;  %3048 = vmatprep.subr.bf16.mxu1 %v5974_v32  ;;  %v3116_v31 = vld [vmem:[%s7622_s5 + $0x38] sm:$0xff] }
 0x1e0   : > { %3023 = vmatprep.subr.bf16.mxu0 %v5977_v34  ;;  %v5523_v32 = vpack.c.bf16 %v3116_v31, %v3115_v30  ;;  %v3133_v34 = vld [vmem:[%s7622_s5 + $0xc0] sm:$0xff]  ;;  %v3090_v31 = vrot.slane %v3081_v55, %v6425_v8  ;;  %v3263_v55 = vld [vmem:[%s7623_s6 + $0x190] sm:$0xff] }
 0x1e2   : > { %3049 = vmatpush1.bf16.msra.mxu1 %v5972_v38  ;;  %v3134_v38 = vld [vmem:[%s7622_s5 + $0xc8] sm:$0xff] }
 0x1e3   : > { %3024 = vmatpush1.bf16.msra.mxu0 %v5975_v39  ;;  %3050 = vmatprep.subr.bf16.mxu1 %v5980_v40  ;;  %v5525_v39 = vpack.c.bf16 %v3134_v38, %v3133_v34  ;;  %v3117_v40 = vld [vmem:[%s7622_s5 + $0x40] sm:$0xff] }
 0x1e4   : > { %3025 = vmatprep.subr.bf16.mxu0 %v5983_v41  ;;  %v3118_v41 = vld [vmem:[%s7622_s5 + $0x48] sm:$0xff] }
 0x1e6   : > { %3051 = vmatpush1.bf16.msra.mxu1 %v5978_v42  ;;  %v5527_v42 = vpack.c.bf16 %v3118_v41, %v3117_v40 }
 0x1e7   : > { %3026 = vmatpush1.bf16.msra.mxu0 %v5981_v43  ;;  %3052 = vmatprep.subr.bf16.mxu1 %v5986_v44  ;;  %v3135_v43 = vld [vmem:[%s7622_s5 + $0xd0] sm:$0xff]  ;;  %v3136_v44 = vld [vmem:[%s7622_s5 + $0xd8] sm:$0xff] }
 0x1e8   : > { %3027 = vmatprep.subr.bf16.mxu0 %v5989_v33  ;;  %v5529_v33 = vpack.c.bf16 %v3136_v44, %v3135_v43 }
 0x1ea   : > { %3053 = vmatpush1.bf16.msra.mxu1 %v5984_v45  ;;  %v3119_v45 = vld [vmem:[%s7622_s5 + $0x50] sm:$0xff] }
 0x1eb   : > { %3028 = vmatpush1.bf16.msra.mxu0 %v5987_v49  ;;  %5510 = vmatprep.subr.bf16.mxu1 %v5509_v10  ;;  %v3120_v49 = vld [vmem:[%s7622_s5 + $0x58] sm:$0xff] }
 0x1ed   : > { %3071 = vmatmul.mubr.bf16.vlgmr.msra.gmra.mrb[36].mxu1 %v2753_v52  ;;  %v5531_v52 = vpack.c.bf16 %v3120_v49, %v3119_v45 }
 0x1ee   : > { %3030 = vmatmul.mubr.bf16.vlgmr.msra.gmra.mrb[20].mxu0 %v2751_v53  ;;  %5512 = vmatpush3.bf16.msra.mxu1 %v5511_v14  ;;  %v3137_v53 = vld [vmem:[%s7622_s5 + $0xe0] sm:$0xff] }
 0x1ef   : > { %3801 = vmatprep.mubr.bf16.mxu0 %v5999_v4  ;;  %5514 = vmatprep.subr.bf16.mxu1 %v5513_v15 }
 0x1f2   : > { %5516 = vmatpush3.bf16.msra.mxu1 %v5515_v47 }
 0x1f3   : > { %5518 = vmatprep.subr.bf16.mxu1 %v5517_v21 }
 0x1f6   : > { %5520 = vmatpush3.bf16.msra.mxu1 %v5519_v25 }
 0x1f7   : > { %5522 = vmatprep.subr.bf16.mxu1 %v5521_v29 }
 0x1fa   : > { %5524 = vmatpush3.bf16.msra.mxu1 %v5523_v32 }
 0x1fb   : > { %5526 = vmatprep.subr.bf16.mxu1 %v5525_v39 }
 0x1fe   : > { %5528 = vmatpush3.bf16.msra.mxu1 %v5527_v42 }
 0x1ff   : > { %5530 = vmatprep.subr.bf16.mxu1 %v5529_v33 }
 0x200   : > { %v1606_v36 = vpop.f32.mrb[20].mxu1  ;;  %v1565_v50 = vpop.f32.mrb[4].mxu0 }
 0x201   : > { %v1607_v51 = vadd.f32 %v1606_v36, %v1565_v50  ;;  %v1608_v60 = vpop.f32.mrb[21].mxu1  ;;  %v1567_v56 = vpop.f32.mrb[5].mxu0  ;;  %v3138_v36 = vld [vmem:[%s7622_s5 + $0xe8] sm:$0xff]  ;;  %v3121_v50 = vld [vmem:[%s7622_s5 + $0x60] sm:$0xff] }
 0x202   : > { %v1609_v57 = vadd.f32 %v1608_v60, %v1567_v56  ;;  %v1610_v58 = vpop.f32.mrb[22].mxu1  ;;  %v1569_v59 = vpop.f32.mrb[6].mxu0  ;;  %5532 = vmatpush3.bf16.msra.mxu1 %v5531_v52  ;;  %v3122_v60 = vld [vmem:[%s7622_s5 + $0x68] sm:$0xff]  ;;  %v3139_v56 = vld [vmem:[%s7622_s5 + $0xf0] sm:$0xff] }
 0x203   : > { %v1611_v61 = vpop.f32.mrb[23].mxu1  ;;  %v1570_v62 = vpop.f32.mrb[7].mxu0  ;;  %v5535_v58 = vpack.c.bf16 %v3122_v60, %v3121_v50 }
 0x204   : > { %v3123_v61 = vld [vmem:[%s7622_s5 + $0x70] sm:$0xff]  ;;  %v3124_v62 = vld [vmem:[%s7622_s5 + $0x78] sm:$0xff] }
 0x221   : > { %v1928_v0 = vpop.f32.mrb[8].mxu0 }
 0x222   : > { %v1930_v2 = vpop.f32.mrb[9].mxu0 }
 0x223   : > { %v1932_v3 = vpop.f32.mrb[10].mxu0 }
 0x224   : > { %v1933_v37 = vpop.f32.mrb[11].mxu0 }
 0x240   : > { %v1887_v54 = vpop.f32.mrb[24].mxu1 }
 0x241   : > { %v1888_v19 = vadd.f32 %v1887_v54, %v1607_v51  ;;  %v1889_v20 = vpop.f32.mrb[25].mxu1  ;;  %v5533_v51 = vpack.c.bf16 %v3138_v36, %v3137_v53 }
 0x242   : > { %v1890_v22 = vadd.f32 %v1889_v20, %v1609_v57  ;;  %v1891_v23 = vpop.f32.mrb[26].mxu1  ;;  %v3140_v57 = vld [vmem:[%s7622_s5 + $0xf8] sm:$0xff] }
 0x243   : > { %v1929_v63 = vadd.f32 %v1928_v0, %v1888_v19  ;;  %v1892_v24 = vpop.f32.mrb[27].mxu1  ;;  %v5537_v59 = vpack.c.bf16 %v3140_v57, %v3139_v56  ;;  %5534 = vmatprep.subr.bf16.mxu1 %v5533_v51  ;;  %v5539_v0 = vpack.c.bf16 %v3124_v62, %v3123_v61  ;;  %v3229_v61 = vld [vmem:[%s7623_s6 + $0x80] sm:$0xff]  ;;  %v3214_v62 = vld [vmem:[%s7623_s6 + $0x8] sm:$0xff] }
 0x244   : > { %v1931_v28 = vadd.f32 %v1930_v2, %v1890_v22  ;;  %5536 = vmatpush3.bf16.msra.mxu1 %v5535_v58 }
 0x245   : > { %5538 = vmatprep.subr.bf16.mxu1 %v5537_v59  ;;  %v3213_v59 = vld [vmem:[%s7623_s6] sm:$0xff] }
 0x248   : > { %5540 = vmatpush3.bf16.msra.mxu1 %v5539_v0  ;;  %v5321_v0 = vcombine.low %v3213_v59, %v3229_v61 }
 0x260   : > { %v2308_v2 = vpop.f32.mrb[28].mxu1 }
 0x261   : > { %v2267_v3 = vpop.f32.mrb[12].mxu0  ;;  %v2310_v37 = vpop.f32.mrb[29].mxu1 }
 0x262   : > { %v2309_v35 = vadd.f32 %v2308_v2, %v2267_v3  ;;  %v2269_v5 = vpop.f32.mrb[13].mxu0  ;;  %v2312_v7 = vpop.f32.mrb[30].mxu1  ;;  %v5322_v2 = vcombine.high %v3213_v59, %v3229_v61  ;;  %v3230_v3 = vld [vmem:[%s7623_s6 + $0x88] sm:$0xff]  ;;  %v3251_v59 = vld [vmem:[%s7623_s6 + $0x130] sm:$0xff] }
 0x263   : > { %v2311_v10 = vadd.f32 %v2310_v37, %v2269_v5  ;;  %v2271_v11 = vpop.f32.mrb[14].mxu0  ;;  %v2313_v12 = vpop.f32.mrb[31].mxu1  ;;  %v5323_v37 = vcombine.low %v3214_v62, %v3230_v3  ;;  %v3245_v5 = vld [vmem:[%s7623_s6 + $0x100] sm:$0xff]  ;;  %v3267_v61 = vld [vmem:[%s7623_s6 + $0x1b0] sm:$0xff] }
 0x264   : > { %v2315_v13 = vadd.f32 %v2309_v35, %v1929_v63  ;;  %v2272_v14 = vpop.f32.mrb[15].mxu0  ;;  %v5324_v35 = vcombine.high %v3214_v62, %v3230_v3  ;;  %3769 = vmatprep.subr.bf16.mxu0 %v5322_v2  ;;  %v3261_v7 = vld [vmem:[%s7623_s6 + $0x180] sm:$0xff]  ;;  %v3252_v62 = vld [vmem:[%s7623_s6 + $0x138] sm:$0xff] }
 0x265   : > { %v2316_v15 = vadd.f32 %v2311_v10, %v1931_v28  ;;  %3770 = vmatpush1.bf16.msra.mxu0 %v5321_v0  ;;  %v3246_v10 = vld [vmem:[%s7623_s6 + $0x108] sm:$0xff]  ;;  %v5353_v11 = vcombine.low %v3245_v5, %v3261_v7  ;;  %v5354_v12 = vcombine.high %v3245_v5, %v3261_v7  ;;  %v3268_v0 = vld [vmem:[%s7623_s6 + $0x1b8] sm:$0xff]  ;;  %v3221_v5 = vld [vmem:[%s7623_s6 + $0x40] sm:$0xff] }
 0x266   : > { %3810 = vmatprep.subr.bf16.mxu1 %v5324_v35  ;;  %v5368_v35 = vcombine.high %v3252_v62, %v3268_v0  ;;  %v3237_v7 = vld [vmem:[%s7623_s6 + $0xc0] sm:$0xff] }
 0x267   : > { %3771 = vmatprep.subr.bf16.mxu0 %v5354_v12  ;;  %v5365_v12 = vcombine.low %v3251_v59, %v3267_v61 }
 0x269   : > { %3772 = vmatpush1.bf16.msra.mxu0 %v5353_v11  ;;  %v3238_v11 = vld [vmem:[%s7623_s6 + $0xc8] sm:$0xff] }
 0x281   : > { %v2693_v16 = vpop.f32.mrb[16].mxu0 }
 0x282   : > { %v2695_v46 = vpop.f32.mrb[17].mxu0 }
 0x283   : > { %v2697_v47 = vpop.f32.mrb[18].mxu0 }
 0x284   : > { %v2698_v54 = vpop.f32.mrb[19].mxu0  ;;  %v3216_v47 = vld [vmem:[%s7623_s6 + $0x18] sm:$0xff] }
 0x2a0   : > { %v2652_v17 = vpop.f32.mrb[32].mxu1 }
 0x2a1   : > { %v2694_v18 = vadd.f32 %v2693_v16, %v2652_v17  ;;  %v2654_v19 = vpop.f32.mrb[33].mxu1  ;;  %v3215_v16 = vld [vmem:[%s7623_s6 + $0x10] sm:$0xff] }
 0x2a2   : > { %v2696_v20 = vadd.f32 %v2695_v46, %v2654_v19  ;;  %v2656_v21 = vpop.f32.mrb[34].mxu1  ;;  %v3231_v46 = vld [vmem:[%s7623_s6 + $0x90] sm:$0xff] }
 0x2a3   : > { %v2700_v22 = vadd.f32 %v2694_v18, %v2315_v13  ;;  %v2657_v23 = vpop.f32.mrb[35].mxu1  ;;  %v3262_v13 = vld [vmem:[%s7623_s6 + $0x188] sm:$0xff]  ;;  %v5325_v54 = vcombine.low %v3215_v16, %v3231_v46  ;;  %v5326_v17 = vcombine.high %v3215_v16, %v3231_v46  ;;  %v3232_v18 = vld [vmem:[%s7623_s6 + $0x98] sm:$0xff]  ;;  %v3253_v16 = vld [vmem:[%s7623_s6 + $0x140] sm:$0xff] }
 0x2a4   : > { %v2701_v48 = vadd.f32 %v2696_v20, %v2316_v15  ;;  %v5355_v14 = vcombine.low %v3246_v10, %v3262_v13  ;;  %v5356_v15 = vcombine.high %v3246_v10, %v3262_v13  ;;  %v5327_v19 = vcombine.low %v3216_v47, %v3232_v18  ;;  %v3222_v10 = vld [vmem:[%s7623_s6 + $0x48] sm:$0xff]  ;;  %v3269_v46 = vld [vmem:[%s7623_s6 + $0x1c0] sm:$0xff] }
 0x2a5   : > { %v5328_v20 = vcombine.high %v3216_v47, %v3232_v18  ;;  %3851 = vmatprep.subr.bf16.mxu0 %v5326_v17  ;;  %v5367_v13 = vcombine.low %v3252_v62, %v3268_v0  ;;  %v3254_v47 = vld [vmem:[%s7623_s6 + $0x148] sm:$0xff]  ;;  %v5337_v17 = vcombine.low %v3221_v5, %v3237_v7  ;;  %v5339_v18 = vcombine.low %v3222_v10, %v3238_v11 }
 0x2c0   : > { %v3072_v24 = vpop.f32.mrb[36].mxu1 }
 0x2c1   : > { %v3031_v63 = vpop.f32.mrb[20].mxu0  ;;  %v3074_v25 = vpop.f32.mrb[37].mxu1 }
 0x2c2   : > { %v3073_v28 = vadd.f32 %v3072_v24, %v3031_v63  ;;  %v3033_v27 = vpop.f32.mrb[21].mxu0  ;;  %v3076_v29 = vpop.f32.mrb[38].mxu1  ;;  %v3248_v24 = vld [vmem:[%s7623_s6 + $0x118] sm:$0xff] }
 0x2c3   : > { %v3075_v30 = vadd.f32 %v3074_v25, %v3033_v27  ;;  %v3035_v32 = vpop.f32.mrb[22].mxu0  ;;  %v3077_v34 = vpop.f32.mrb[39].mxu1  ;;  %v3264_v63 = vld [vmem:[%s7623_s6 + $0x198] sm:$0xff]  ;;  %v3217_v29 = vld [vmem:[%s7623_s6 + $0x20] sm:$0xff] }
 0x2c4   : > { %v3079_v38 = vadd.f32 %v3073_v28, %v2700_v22  ;;  %v3036_v39 = vpop.f32.mrb[23].mxu0  ;;  %v5360_v27 = vcombine.high %v3248_v24, %v3264_v63  ;;  %v3234_v32 = vld [vmem:[%s7623_s6 + $0xa8] sm:$0xff] }
 0x2c5   : > { %v3080_v40 = vadd.f32 %v3075_v30, %v2701_v48  ;;  %v3247_v48 = vld [vmem:[%s7623_s6 + $0x110] sm:$0xff]  ;;  %v3233_v30 = vld [vmem:[%s7623_s6 + $0xa0] sm:$0xff] }
 0x2c6   : > { %v3093_v41 = vadd.f32 %v3086_v26, %v3079_v38  ;;  %v5358_v26 = vcombine.high %v3247_v48, %v3263_v55  ;;  %v5357_v34 = vcombine.low %v3247_v48, %v3263_v55  ;;  %v5359_v38 = vcombine.low %v3248_v24, %v3264_v63  ;;  %v3240_v48 = vld [vmem:[%s7623_s6 + $0xd8] sm:$0xff] }
 0x2c7   : > { %v3094_v42 = vadd.f32 %v3090_v31, %v3080_v40  ;;  %v3218_v31 = vld [vmem:[%s7623_s6 + $0x28] sm:$0xff]  ;;  %v5330_v39 = vcombine.high %v3217_v29, %v3233_v30  ;;  %v5369_v55 = vcombine.low %v3253_v16, %v3269_v46 }
 0x2c8   : > { %v3095_v43 = vmax.f32 %v3093_v41, 0.0  ;;  %v5332_v40 = vcombine.high %v3218_v31, %v3234_v32  ;;  %v3249_v41 = vld [vmem:[%s7623_s6 + $0x120] sm:$0xff] }
 0x2c9   : > { %v3096_v44 = vmax.f32 %v3094_v42, 0.0  ;;  %v3265_v42 = vld [vmem:[%s7623_s6 + $0x1a0] sm:$0xff] }
 0x2ca   : > { %v3097_v33 = vrot.slane %v3095_v43, 4 }
 0x2cb   : > { %v3103_v45 = vrot.slane %v3096_v44, 4 }
 0x2cc   : > { %v3098_v49 = vadd.f32 %v3097_v33, %v3095_v43  ;;  %v3250_v43 = vld [vmem:[%s7623_s6 + $0x128] sm:$0xff]  ;;  %v5329_v33 = vcombine.low %v3217_v29, %v3233_v30  ;;  %v3256_v29 = vld [vmem:[%s7623_s6 + $0x158] sm:$0xff] }
 0x2cd   : > { %v3104_v52 = vadd.f32 %v3103_v45, %v3096_v44  ;;  %v3266_v44 = vld [vmem:[%s7623_s6 + $0x1a8] sm:$0xff]  ;;  %v5331_v45 = vcombine.low %v3218_v31, %v3234_v32  ;;  %v3272_v30 = vld [vmem:[%s7623_s6 + $0x1d8] sm:$0xff] }
 0x2ce   : > { %v3099_v53 = vrot.slane %v3098_v49, 2 }
 0x2cf   : > { %v3105_v36 = vrot.slane %v3104_v52, 2 }
 0x2d0   : > { %v3100_v50 = vadd.f32 %v3099_v53, %v3098_v49  ;;  %v5362_v49 = vcombine.high %v3249_v41, %v3265_v42  ;;  %v3219_v53 = vld [vmem:[%s7623_s6 + $0x30] sm:$0xff] }
 0x2d1   : > { %v3106_v51 = vadd.f32 %v3105_v36, %v3104_v52  ;;  %v5364_v52 = vcombine.high %v3250_v43, %v3266_v44  ;;  %v3235_v36 = vld [vmem:[%s7623_s6 + $0xb0] sm:$0xff] }
 0x2d2   : > { %v3101_v60 = vrot.slane %v3100_v50, 1  ;;  %v5333_v2 = vcombine.low %v3219_v53, %v3235_v36 }
 0x2d3   : > { %v3107_v56 = vrot.slane %v3106_v51, 1 }
 0x2d4   : > { %v3102_v58 = vadd.f32 %v3101_v60, %v3100_v50  ;;  %v3220_v50 = vld [vmem:[%s7623_s6 + $0x38] sm:$0xff]  ;;  %v5361_v60 = vcombine.low %v3249_v41, %v3265_v42  ;;  %v3226_v41 = vld [vmem:[%s7623_s6 + $0x68] sm:$0xff] }
 0x2d5   : > { %v3108_v57 = vadd.f32 %v3107_v56, %v3106_v51  ;;  %v3236_v51 = vld [vmem:[%s7623_s6 + $0xb8] sm:$0xff]  ;;  %v5363_v56 = vcombine.low %v3250_v43, %v3266_v44  ;;  %v3242_v42 = vld [vmem:[%s7623_s6 + $0xe8] sm:$0xff]  ;;  %v5375_v44 = vcombine.low %v3256_v29, %v3272_v30 }
 0x2d6   : > { %v5335_v3 = vcombine.low %v3220_v50, %v3236_v51 }
 0x2d7   : > { %3205 = vmatprep.mubr.f32.mxu1 %v3108_v57  ;;  %v5334_v57 = vcombine.high %v3219_v53, %v3235_v36  ;;  %v3258_v53 = vld [vmem:[%s7623_s6 + $0x168] sm:$0xff] }
 0x2d8   : > { %3206 = vmatmul.mubr.f32.vlgmr.msra.gmra.mrb[40].mxu1 %v3102_v58  ;;  %v5336_v58 = vcombine.high %v3220_v50, %v3236_v51  ;;  %v3274_v36 = vld [vmem:[%s7623_s6 + $0x1e8] sm:$0xff]  ;;  %v5347_v51 = vcombine.low %v3226_v41, %v3242_v42 }
 0x2d9   : > { %3842 = vmatprep.mubr.bf16.mxu1 %v5999_v4  ;;  %3811 = vmatpush1.bf16.msra.mxu1 %v5323_v37  ;;  %v5366_v37 = vcombine.high %v3251_v59, %v3267_v61  ;;  %v3228_v59 = vld [vmem:[%s7623_s6 + $0x78] sm:$0xff]  ;;  %v5379_v0 = vcombine.low %v3258_v53, %v3274_v36 }
 0x2da   : > { %3812 = vmatprep.subr.bf16.mxu1 %v5356_v15  ;;  %v5340_v15 = vcombine.high %v3222_v10, %v3238_v11  ;;  %v3244_v61 = vld [vmem:[%s7623_s6 + $0xf8] sm:$0xff] }
 0x2db   : > { %v5351_v11 = vcombine.low %v3228_v59, %v3244_v61 }
 0x2dd   : > { %3813 = vmatpush1.bf16.msra.mxu1 %v5355_v14  ;;  %v5338_v14 = vcombine.high %v3221_v5, %v3237_v7  ;;  %v3260_v5 = vld [vmem:[%s7623_s6 + $0x178] sm:$0xff] }
 0x2de   : > { %3892 = vmatprep.subr.bf16.mxu1 %v5328_v20  ;;  %v3276_v7 = vld [vmem:[%s7623_s6 + $0x1f8] sm:$0xff] }
 0x3ab   : > { %v5456_v21 = vpop.f32.mrb[40].mxu1 }
 0x3ac   : > { %v5457_v22 = vpop.f32.mrb[41].mxu1 }
 0x3ad   : > { %v5458_v23 = vadd.f32 %v5457_v22, %v5456_v21  ;;  %v3223_v21 = vld [vmem:[%s7623_s6 + $0x50] sm:$0xff] }
 0x3ae   : > { %v3239_v22 = vld [vmem:[%s7623_s6 + $0xd0] sm:$0xff] }
 0x3af   : > { %v3211_v25 = vmul.f32 0.015625, %v5458_v23  ;;  %v3224_v23 = vld [vmem:[%s7623_s6 + $0x58] sm:$0xff]  ;;  %v5342_v63 = vcombine.high %v3223_v21, %v3239_v22  ;;  %v5341_v31 = vcombine.low %v3223_v21, %v3239_v22 }
 0x3b0   : > { %v5343_v32 = vcombine.low %v3224_v23, %v3240_v48 }
 0x3b1   : > { %v7213_v28 = vpack.c.bf16 %v3211_v25, %v3211_v25  ;;  %v5344_v25 = vcombine.high %v3224_v23, %v3240_v48 }
 0x3b3   : > { %5385 = vmatmul.mubr.msk.bf16.vlgmr.msra.gmra.mrb[24].mxu0 %vm3765_vm2, %v7213_v28  ;;  %5386 = vmatmul.mubr.msk.bf16.vlgmr.msra.gmra.mrb[44].mxu1 %vm3765_vm2, %v7213_v28 }
 0x3b4   : > { %3852 = vmatpush1.bf16.msra.mxu0 %v5325_v54  ;;  %3893 = vmatpush1.bf16.msra.mxu1 %v5327_v19  ;;  %v3270_v54 = vld [vmem:[%s7623_s6 + $0x1c8] sm:$0xff]  ;;  %v5370_v19 = vcombine.high %v3253_v16, %v3269_v46  ;;  %v3277_v16 = vld [vmem:[%s7624_s7] sm:$0xff]  ;;  %v7409_v46 = vsub.s32 3, %v6416_v1 }
 0x3b5   : > { %3853 = vmatprep.subr.bf16.mxu0 %v5358_v26  ;;  %3894 = vmatprep.subr.bf16.mxu1 %v5360_v27  ;;  %v5372_v20 = vcombine.high %v3254_v47, %v3270_v54  ;;  %v5371_v24 = vcombine.low %v3254_v47, %v3270_v54  ;;  %v3255_v26 = vld [vmem:[%s7623_s6 + $0x150] sm:$0xff]  ;;  %v3608_v47 = vrot.slane %v3277_v16, %v6419_v6 }
 0x3b6   : > { %3883 = vmatprep.mubr.bf16.mxu0 %v5999_v4  ;;  %3924 = vmatprep.mubr.bf16.mxu1 %v5999_v4  ;;  %v3271_v27 = vld [vmem:[%s7623_s6 + $0x1d0] sm:$0xff]  ;;  %v3616_v54 = vrot.slane %v3277_v16, %v6428_v9 }
 0x3b7   : > { %v5373_v43 = vcombine.low %v3255_v26, %v3271_v27 }
 0x3b8   : > { %3854 = vmatpush1.bf16.msra.mxu0 %v5357_v34  ;;  %3895 = vmatpush1.bf16.msra.mxu1 %v5359_v38  ;;  %v5374_v34 = vcombine.high %v3255_v26, %v3271_v27  ;;  %v5376_v38 = vcombine.high %v3256_v29, %v3272_v30 }
 0x3b9   : > { %3933 = vmatprep.subr.bf16.mxu0 %v5330_v39  ;;  %3974 = vmatprep.subr.bf16.mxu1 %v5332_v40  ;;  %v3225_v39 = vld [vmem:[%s7623_s6 + $0x60] sm:$0xff] }
 0x3ba   : > { %v3241_v40 = vld [vmem:[%s7623_s6 + $0xe0] sm:$0xff] }
 0x3bb   : > { %5387 = vmatmul.mubr.msk.bf16.vlgmr.msra.gmra.mrb[28].mxu0 %vm3765_vm2, %v7213_v28  ;;  %5388 = vmatmul.mubr.msk.bf16.vlgmr.msra.gmra.mrb[48].mxu1 %vm3765_vm2, %v7213_v28  ;;  %v5345_v50 = vcombine.low %v3225_v39, %v3241_v40 }
 0x3bc   : > { %3934 = vmatpush1.bf16.msra.mxu0 %v5329_v33  ;;  %3975 = vmatpush1.bf16.msra.mxu1 %v5331_v45  ;;  %v5346_v33 = vcombine.high %v3225_v39, %v3241_v40  ;;  %v5348_v45 = vcombine.high %v3226_v41, %v3242_v42 }
 0x3bd   : > { %3935 = vmatprep.subr.bf16.mxu0 %v5362_v49  ;;  %3976 = vmatprep.subr.bf16.mxu1 %v5364_v52  ;;  %v3257_v49 = vld [vmem:[%s7623_s6 + $0x160] sm:$0xff] }
 0x3be   : > { %3965 = vmatprep.mubr.bf16.mxu0 %v5999_v4  ;;  %4006 = vmatprep.mubr.bf16.mxu1 %v5999_v4  ;;  %v3273_v52 = vld [vmem:[%s7623_s6 + $0x1e0] sm:$0xff] }
 0x3bf   : > { %v5377_v62 = vcombine.low %v3257_v49, %v3273_v52 }
 0x3c0   : > { %3936 = vmatpush1.bf16.msra.mxu0 %v5361_v60  ;;  %3977 = vmatpush1.bf16.msra.mxu1 %v5363_v56  ;;  %v5378_v60 = vcombine.high %v3257_v49, %v3273_v52  ;;  %v5380_v56 = vcombine.high %v3258_v53, %v3274_v36 }
 0x3c1   : > { %4015 = vmatprep.subr.bf16.mxu0 %v5334_v57  ;;  %4056 = vmatprep.subr.bf16.mxu1 %v5336_v58  ;;  %v3227_v57 = vld [vmem:[%s7623_s6 + $0x70] sm:$0xff] }
 0x3c2   : > { %v3243_v58 = vld [vmem:[%s7623_s6 + $0xf0] sm:$0xff] }
 0x3c3   : > { %5389 = vmatmul.mubr.msk.bf16.vlgmr.msra.gmra.mrb[32].mxu0 %vm3765_vm2, %v7213_v28  ;;  %5390 = vmatmul.mubr.msk.bf16.vlgmr.msra.gmra.mrb[52].mxu1 %vm3765_vm2, %v7213_v28  ;;  %v5349_v10 = vcombine.low %v3227_v57, %v3243_v58 }
 0x3c4   : > { %4016 = vmatpush1.bf16.msra.mxu0 %v5333_v2  ;;  %4057 = vmatpush1.bf16.msra.mxu1 %v5335_v3  ;;  %v5350_v2 = vcombine.high %v3227_v57, %v3243_v58  ;;  %v5352_v3 = vcombine.high %v3228_v59, %v3244_v61 }
 0x3c5   : > { %4017 = vmatprep.subr.bf16.mxu0 %v5366_v37  ;;  %4058 = vmatprep.subr.bf16.mxu1 %v5368_v35  ;;  %v3259_v37 = vld [vmem:[%s7623_s6 + $0x170] sm:$0xff] }
 0x3c6   : > { %4047 = vmatprep.mubr.bf16.mxu0 %v5999_v4  ;;  %4088 = vmatprep.mubr.bf16.mxu1 %v5999_v4  ;;  %v3275_v35 = vld [vmem:[%s7623_s6 + $0x1f0] sm:$0xff] }
 0x3c8   : > { %4018 = vmatpush1.bf16.msra.mxu0 %v5365_v12  ;;  %4059 = vmatpush1.bf16.msra.mxu1 %v5367_v13  ;;  %v5382_v12 = vcombine.high %v3259_v37, %v3275_v35  ;;  %v5384_v13 = vcombine.high %v3260_v5, %v3276_v7 }
 0x3c9   : > { %4097 = vmatprep.subr.bf16.mxu0 %v5338_v14  ;;  %4138 = vmatprep.subr.bf16.mxu1 %v5340_v15  ;;  %v5381_v14 = vcombine.low %v3259_v37, %v3275_v35  ;;  %v5383_v15 = vcombine.low %v3260_v5, %v3276_v7 }
 0x3cb   : > { %5391 = vmatmul.mubr.msk.bf16.vlgmr.msra.gmra.mrb[36].mxu0 %vm3765_vm2, %v7213_v28  ;;  %5392 = vmatmul.mubr.msk.bf16.vlgmr.msra.gmra.mrb[56].mxu1 %vm3765_vm2, %v7213_v28 }
 0x3cc   : > { %4098 = vmatpush1.bf16.msra.mxu0 %v5337_v17  ;;  %4139 = vmatpush1.bf16.msra.mxu1 %v5339_v18  ;;  %v3612_v17 = vrot.slane %v3277_v16, %v6425_v8 }
 0x3cd   : > { %4099 = vmatprep.subr.bf16.mxu0 %v5370_v19  ;;  %4140 = vmatprep.subr.bf16.mxu1 %v5372_v20 }
 0x3ce   : > { %4129 = vmatprep.mubr.bf16.mxu0 %v5999_v4  ;;  %4170 = vmatprep.mubr.bf16.mxu1 %v5999_v4 }
 0x3d0   : > { %4100 = vmatpush1.bf16.msra.mxu0 %v5369_v55  ;;  %4141 = vmatpush1.bf16.msra.mxu1 %v5371_v24 }
 0x3d1   : > { %4179 = vmatprep.subr.bf16.mxu0 %v5342_v63  ;;  %4220 = vmatprep.subr.bf16.mxu1 %v5344_v25  ;;  %v7427_v63 = vsub.s32 4, %v6416_v1  ;;  %v7430_v25 = vsub.s32 6, %v6416_v1 }
 0x3d3   : > { %5393 = vmatmul.mubr.msk.bf16.vlgmr.msra.gmra.mrb[40].mxu0 %vm3765_vm2, %v7213_v28  ;;  %5394 = vmatmul.mubr.msk.bf16.vlgmr.msra.gmra.mrb[60].mxu1 %vm3765_vm2, %v7213_v28 }
 0x3d4   : > { %4180 = vmatpush1.bf16.msra.mxu0 %v5341_v31  ;;  %4221 = vmatpush1.bf16.msra.mxu1 %v5343_v32  ;;  %v7433_v31 = vsub.s32 5, %v6416_v1  ;;  %v7436_v32 = vsub.s32 7, %v6416_v1 }
 0x3d5   : > { %4181 = vmatprep.subr.bf16.mxu0 %v5374_v34  ;;  %4222 = vmatprep.subr.bf16.mxu1 %v5376_v38 }
 0x3d6   : > { %4211 = vmatprep.mubr.bf16.mxu0 %v5999_v4  ;;  %4252 = vmatprep.mubr.bf16.mxu1 %v5999_v4  ;;  %v3628_v1 = vrot.slane %v3277_v16, %v7433_v31  ;;  %v3636_v53 = vrot.slane %v3277_v16, %v7436_v32 }
 0x3d8   : > { %4182 = vmatpush1.bf16.msra.mxu0 %v5373_v43  ;;  %4223 = vmatpush1.bf16.msra.mxu1 %v5375_v44 }
 0x3d9   : > { %4261 = vmatprep.subr.bf16.mxu0 %v5346_v33  ;;  %4302 = vmatprep.subr.bf16.mxu1 %v5348_v45  ;;  %v3624_v33 = vrot.slane %v3277_v16, %v7427_v63  ;;  %v3632_v45 = vrot.slane %v3277_v16, %v7430_v25 }
 0x3db   : > { %5395 = vmatmul.mubr.msk.bf16.vlgmr.msra.gmra.mrb[44].mxu0 %vm3765_vm2, %v7213_v28  ;;  %5396 = vmatmul.mubr.msk.bf16.vlgmr.msra.gmra.mrb[64].mxu1 %vm3765_vm2, %v7213_v28 }
 0x3dc   : > { %4262 = vmatpush1.bf16.msra.mxu0 %v5345_v50  ;;  %4303 = vmatpush1.bf16.msra.mxu1 %v5347_v51 }
 0x3dd   : > { %4263 = vmatprep.subr.bf16.mxu0 %v5378_v60  ;;  %4304 = vmatprep.subr.bf16.mxu1 %v5380_v56 }
 0x3de   : > { %4293 = vmatprep.mubr.bf16.mxu0 %v5999_v4  ;;  %4334 = vmatprep.mubr.bf16.mxu1 %v5999_v4 }
 0x3e0   : > { %4264 = vmatpush1.bf16.msra.mxu0 %v5377_v62  ;;  %4305 = vmatpush1.bf16.msra.mxu1 %v5379_v0 }
 0x3e1   : > { %4343 = vmatprep.subr.bf16.mxu0 %v5350_v2  ;;  %4384 = vmatprep.subr.bf16.mxu1 %v5352_v3  ;;  %v7451_v2 = vld [vmem:[%s7624_s7 + $0x8] sm:$0xff] }
 0x3e3   : > { %5397 = vmatmul.mubr.msk.bf16.vlgmr.msra.gmra.mrb[48].mxu0 %vm3765_vm2, %v7213_v28  ;;  %5398 = vmatmul.mubr.msk.bf16.vlgmr.msra.gmra.mrb[68].mxu1 %vm3765_vm2, %v7213_v28 }
 0x3e4   : > { %4344 = vmatpush1.bf16.msra.mxu0 %v5349_v10  ;;  %4385 = vmatpush1.bf16.msra.mxu1 %v5351_v11 }
 0x3e5   : > { %4345 = vmatprep.subr.bf16.mxu0 %v5382_v12  ;;  %4386 = vmatprep.subr.bf16.mxu1 %v5384_v13 }
 0x3e6   : > { %4375 = vmatprep.mubr.bf16.mxu0 %v5999_v4  ;;  %4416 = vmatprep.mubr.bf16.mxu1 %v5999_v4  ;;  %v7415_v4 = vld [vmem:[%s7625_s8] sm:$0xff] }
 0x3e7   : > { %v4468_v19 = vrot.slane %v7415_v4, %v6419_v6  ;;  %v4476_v21 = vrot.slane %v7415_v4, %v6428_v9  ;;  %v4472_v22 = vrot.slane %v7415_v4, %v6425_v8  ;;  %v4480_v43 = vrot.slane %v7415_v4, %v7409_v46 }
 0x3e8   : > { %4346 = vmatpush1.bf16.msra.mxu0 %v5381_v14  ;;  %4387 = vmatpush1.bf16.msra.mxu1 %v5383_v15  ;;  %v4484_v59 = vrot.slane %v7415_v4, %v7427_v63  ;;  %v4488_v35 = vrot.slane %v7415_v4, %v7433_v31  ;;  %v4492_v14 = vrot.slane %v7415_v4, %v7430_v25 }
 0x3eb   : > { %5399 = vmatmul.mubr.msk.bf16.vlgmr.msra.gmra.mrb[52].mxu0 %vm3765_vm2, %v7213_v28  ;;  %5400 = vmatmul.mubr.msk.bf16.vlgmr.msra.gmra.mrb[72].mxu1 %vm3765_vm2, %v7213_v28  ;;  %v3620_v28 = vrot.slane %v3277_v16, %v7409_v46 }
 0x486   : > { %v3803_v18 = vpop.f32.mrb[24].mxu0  ;;  %v3844_v20 = vpop.f32.mrb[44].mxu1 }
 0x487   : > { %v3804_v23 = vadd.f32 %v3803_v18, %v3608_v47  ;;  %v3845_v48 = vadd.f32 %v3844_v20, %v3616_v54  ;;  %v3805_v55 = vpop.f32.mrb[25].mxu0  ;;  %v3846_v24 = vpop.f32.mrb[45].mxu1 }
 0x488   : > { %v3806_v26 = vadd.f32 %v3805_v55, %v3612_v17  ;;  %v3847_v27 = vadd.f32 %v3846_v24, %v3620_v28  ;;  %v3807_v29 = vpop.f32.mrb[26].mxu0  ;;  %v3848_v30 = vpop.f32.mrb[46].mxu1  ;;  %v4496_v17 = vrot.slane %v7415_v4, %v7436_v32  ;;  %v3640_v28 = vrot.slane %v7451_v2, %v6419_v6 }
 0x489   : > { %v4425_v34 = vmax.f32 %v3804_v23, 0.0  ;;  %v4427_v38 = vmax.f32 %v3845_v48, 0.0  ;;  %v3808_v39 = vpop.f32.mrb[27].mxu0  ;;  %v3849_v40 = vpop.f32.mrb[47].mxu1  ;;  %v7468_v23 = vld [vmem:[%s7625_s8 + $0x8] sm:$0xff]  ;;  %v3644_v48 = vrot.slane %v7451_v2, %v6425_v8  ;;  %v3652_v4 = vrot.slane %v7451_v2, %v7409_v46 }
 0x48a   : > { %v4426_v41 = vmax.f32 %v3806_v26, 0.0  ;;  %v4428_v42 = vmax.f32 %v3847_v27, 0.0  ;;  %v4500_v39 = vrot.slane %v7468_v23, %v6419_v6 }
 0x48b   : > { %v4625_v44 = vmul.f32 %v4468_v19, %v4425_v34  ;;  %v4627_v49 = vmul.f32 %v4476_v21, %v4427_v38  ;;  %v3648_v21 = vrot.slane %v7451_v2, %v6428_v9 }
 0x48c   : > { %v4626_v52 = vmul.f32 %v4472_v22, %v4426_v41  ;;  %v4628_v51 = vmul.f32 %v4480_v43, %v4428_v42 }
 0x48d   : > { %v4658_v36 = vsel %vm4657_vm3, %v4625_v44, 0.0  ;;  %v4661_v3 = vsel %vm4657_vm3, %v4627_v49, 0.0 }
 0x48e   : > { %v4659_v50 = vsel %vm4657_vm3, %v4626_v52, 0.0  ;;  %v3885_v60 = vpop.f32.mrb[28].mxu0  ;;  %v3926_v56 = vpop.f32.mrb[48].mxu1  ;;  %v4663_v47 = vsel %vm4657_vm3, %v4628_v51, 0.0 }
 0x48f   : > { %v4660_v57 = vadd.f32 %v4659_v50, %v4658_v36  ;;  %v3886_v58 = vadd.f32 %v3885_v60, %v3624_v33  ;;  %v3927_v61 = vadd.f32 %v3926_v56, %v3632_v45  ;;  %v3887_v62 = vpop.f32.mrb[29].mxu0  ;;  %v3928_v0 = vpop.f32.mrb[49].mxu1  ;;  %v4504_v33 = vrot.slane %v7468_v23, %v6425_v8 }
 0x490   : > { %v3888_v37 = vadd.f32 %v3887_v62, %v3628_v1  ;;  %v3929_v5 = vadd.f32 %v3928_v0, %v3636_v53  ;;  %v3889_v7 = vpop.f32.mrb[30].mxu0  ;;  %v3930_v10 = vpop.f32.mrb[50].mxu1  ;;  %v4508_v50 = vrot.slane %v7468_v23, %v6428_v9 }
 0x491   : > { %v4662_v11 = vadd.f32 %v4661_v3, %v4660_v57  ;;  %v4429_v12 = vmax.f32 %v3886_v58, 0.0  ;;  %v4431_v13 = vmax.f32 %v3927_v61, 0.0  ;;  %v3890_v15 = vpop.f32.mrb[31].mxu0  ;;  %v3931_v16 = vpop.f32.mrb[51].mxu1  ;;  %v4512_v58 = vrot.slane %v7468_v23, %v7409_v46 }
 0x492   : > { %v4430_v54 = vmax.f32 %v3888_v37, 0.0  ;;  %v4432_v20 = vmax.f32 %v3929_v5, 0.0  ;;  %v3664_v3 = vrot.slane %v7451_v2, %v7430_v25  ;;  %v3660_v5 = vrot.slane %v7451_v2, %v7433_v31 }
 0x493   : > { %v4664_v18 = vadd.f32 %v4663_v47, %v4662_v11  ;;  %v4629_v19 = vmul.f32 %v4484_v59, %v4429_v12  ;;  %v4631_v24 = vmul.f32 %v4492_v14, %v4431_v13  ;;  %v3656_v59 = vrot.slane %v7451_v2, %v7427_v63 }
 0x494   : > { %v4630_v22 = vmul.f32 %v4488_v35, %v4430_v54  ;;  %v4632_v34 = vmul.f32 %v4496_v17, %v4432_v20  ;;  %v3668_v7 = vrot.slane %v7451_v2, %v7436_v32  ;;  %v4516_v54 = vrot.slane %v7468_v23, %v7427_v63  ;;  %v7501_v2 = vld [vmem:[%s7624_s7 + $0x10] sm:$0xff] }
 0x495   : > { %v4665_v55 = vsel %vm4657_vm3, %v4629_v19, 0.0  ;;  %v4669_v1 = vsel %vm4657_vm3, %v4631_v24, 0.0 }
 0x496   : > { %v4666_v26 = vadd.f32 %v4665_v55, %v4664_v18  ;;  %v4667_v27 = vsel %vm4657_vm3, %v4630_v22, 0.0  ;;  %v3967_v29 = vpop.f32.mrb[32].mxu0  ;;  %v4008_v30 = vpop.f32.mrb[52].mxu1  ;;  %v4671_v61 = vsel %vm4657_vm3, %v4632_v34, 0.0 }
 0x497   : > { %v3968_v38 = vadd.f32 %v3967_v29, %v3640_v28  ;;  %v4009_v40 = vadd.f32 %v4008_v30, %v3648_v21  ;;  %v3969_v41 = vpop.f32.mrb[33].mxu0  ;;  %v4010_v42 = vpop.f32.mrb[53].mxu1  ;;  %v4520_v21 = vrot.slane %v7468_v23, %v7433_v31 }
 0x498   : > { %v4668_v43 = vadd.f32 %v4667_v27, %v4666_v26  ;;  %v3970_v44 = vadd.f32 %v3969_v41, %v3644_v48  ;;  %v4011_v45 = vadd.f32 %v4010_v42, %v3652_v4  ;;  %v3971_v49 = vpop.f32.mrb[34].mxu0  ;;  %v4012_v52 = vpop.f32.mrb[54].mxu1  ;;  %v4524_v27 = vrot.slane %v7468_v23, %v7430_v25 }
 0x499   : > { %v4433_v53 = vmax.f32 %v3968_v38, 0.0  ;;  %v4435_v36 = vmax.f32 %v4009_v40, 0.0  ;;  %v3972_v51 = vpop.f32.mrb[35].mxu0  ;;  %v4013_v60 = vpop.f32.mrb[55].mxu1  ;;  %v3672_v40 = vrot.slane %v7501_v2, %v6419_v6  ;;  %v7518_v49 = vld [vmem:[%s7625_s8 + $0x10] sm:$0xff]  ;;  %v3684_v52 = vrot.slane %v7501_v2, %v7409_v46 }
 0x49a   : > { %v4670_v56 = vadd.f32 %v4669_v1, %v4668_v43  ;;  %v4434_v57 = vmax.f32 %v3970_v44, 0.0  ;;  %v4436_v0 = vmax.f32 %v4011_v45, 0.0  ;;  %v3680_v44 = vrot.slane %v7501_v2, %v6428_v9 }
 0x49b   : > { %v4633_v62 = vmul.f32 %v4500_v39, %v4433_v53  ;;  %v4635_v11 = vmul.f32 %v4508_v50, %v4435_v36  ;;  %v4528_v39 = vrot.slane %v7468_v23, %v7436_v32  ;;  %v3676_v23 = vrot.slane %v7501_v2, %v6425_v8 }
 0x49c   : > { %v4672_v37 = vadd.f32 %v4671_v61, %v4670_v56  ;;  %v4634_v35 = vmul.f32 %v4504_v33, %v4434_v57  ;;  %v4636_v16 = vmul.f32 %v4512_v58, %v4436_v0  ;;  %v4532_v58 = vrot.slane %v7518_v49, %v6419_v6 }
 0x49d   : > { %v4673_v10 = vsel %vm4657_vm3, %v4633_v62, 0.0  ;;  %v4677_v55 = vsel %vm4657_vm3, %v4635_v11, 0.0 }
 0x49e   : > { %v4674_v12 = vadd.f32 %v4673_v10, %v4672_v37  ;;  %v4675_v13 = vsel %vm4657_vm3, %v4634_v35, 0.0  ;;  %v4049_v14 = vpop.f32.mrb[36].mxu0  ;;  %v4090_v15 = vpop.f32.mrb[56].mxu1  ;;  %v4679_v41 = vsel %vm4657_vm3, %v4636_v16, 0.0  ;;  %v4536_v37 = vrot.slane %v7518_v49, %v6425_v8 }
 0x49f   : > { %v4050_v47 = vadd.f32 %v4049_v14, %v3656_v59  ;;  %v4091_v17 = vadd.f32 %v4090_v15, %v3664_v3  ;;  %v4051_v28 = vpop.f32.mrb[37].mxu0  ;;  %v4092_v18 = vpop.f32.mrb[57].mxu1 }
 0x4a0   : > { %v4676_v19 = vadd.f32 %v4675_v13, %v4674_v12  ;;  %v4052_v20 = vadd.f32 %v4051_v28, %v3660_v5  ;;  %v4093_v22 = vadd.f32 %v4092_v18, %v3668_v7  ;;  %v4053_v48 = vpop.f32.mrb[38].mxu0  ;;  %v4094_v4 = vpop.f32.mrb[58].mxu1  ;;  %v4540_v13 = vrot.slane %v7518_v49, %v6428_v9 }
 0x4a1   : > { %v4437_v24 = vmax.f32 %v4050_v47, 0.0  ;;  %v4439_v26 = vmax.f32 %v4091_v17, 0.0  ;;  %v4054_v29 = vpop.f32.mrb[39].mxu0  ;;  %v4095_v30 = vpop.f32.mrb[59].mxu1  ;;  %v3688_v17 = vrot.slane %v7501_v2, %v7427_v63  ;;  %v3692_v48 = vrot.slane %v7501_v2, %v7433_v31 }
 0x4a2   : > { %v4678_v34 = vadd.f32 %v4677_v55, %v4676_v19  ;;  %v4438_v38 = vmax.f32 %v4052_v20, 0.0  ;;  %v4440_v43 = vmax.f32 %v4093_v22, 0.0  ;;  %v3696_v20 = vrot.slane %v7501_v2, %v7430_v25 }
 0x4a3   : > { %v4637_v42 = vmul.f32 %v4516_v54, %v4437_v24  ;;  %v4639_v53 = vmul.f32 %v4524_v27, %v4439_v26  ;;  %v4544_v54 = vrot.slane %v7518_v49, %v7409_v46  ;;  %v3700_v4 = vrot.slane %v7501_v2, %v7436_v32  ;;  %v7551_v2 = vld [vmem:[%s7624_s7 + $0x18] sm:$0xff] }
 0x4a4   : > { %v4680_v33 = vadd.f32 %v4679_v41, %v4678_v34  ;;  %v4638_v45 = vmul.f32 %v4520_v21, %v4438_v38  ;;  %v4640_v56 = vmul.f32 %v4528_v39, %v4440_v43  ;;  %v4548_v39 = vrot.slane %v7518_v49, %v7427_v63 }
 0x4a5   : > { %v4681_v1 = vsel %vm4657_vm3, %v4637_v42, 0.0  ;;  %v4685_v10 = vsel %vm4657_vm3, %v4639_v53, 0.0 }
 0x4a6   : > { %v4682_v36 = vadd.f32 %v4681_v1, %v4680_v33  ;;  %v4683_v50 = vsel %vm4657_vm3, %v4638_v45, 0.0  ;;  %v4131_v51 = vpop.f32.mrb[40].mxu0  ;;  %v4172_v60 = vpop.f32.mrb[60].mxu1  ;;  %v4687_v28 = vsel %vm4657_vm3, %v4640_v56, 0.0  ;;  %v4552_v33 = vrot.slane %v7518_v49, %v7433_v31 }
 0x4a7   : > { %v4132_v57 = vadd.f32 %v4131_v51, %v3672_v40  ;;  %v4173_v59 = vadd.f32 %v4172_v60, %v3680_v44  ;;  %v4133_v61 = vpop.f32.mrb[41].mxu0  ;;  %v4174_v62 = vpop.f32.mrb[61].mxu1 }
 0x4a8   : > { %v4684_v0 = vadd.f32 %v4683_v50, %v4682_v36  ;;  %v4134_v3 = vadd.f32 %v4133_v61, %v3676_v23  ;;  %v4175_v35 = vadd.f32 %v4174_v62, %v3684_v52  ;;  %v4135_v5 = vpop.f32.mrb[42].mxu0  ;;  %v4176_v7 = vpop.f32.mrb[62].mxu1  ;;  %v4556_v50 = vrot.slane %v7518_v49, %v7430_v25 }
 0x4a9   : > { %v4441_v11 = vmax.f32 %v4132_v57, 0.0  ;;  %v4443_v12 = vmax.f32 %v4173_v59, 0.0  ;;  %v4136_v14 = vpop.f32.mrb[43].mxu0  ;;  %v4177_v15 = vpop.f32.mrb[63].mxu1  ;;  %v3704_v59 = vrot.slane %v7551_v2, %v6419_v6  ;;  %v7568_v5 = vld [vmem:[%s7625_s8 + $0x18] sm:$0xff]  ;;  %v3716_v7 = vrot.slane %v7551_v2, %v7409_v46 }
 0x4aa   : > { %v4686_v16 = vadd.f32 %v4685_v10, %v4684_v0  ;;  %v4442_v47 = vmax.f32 %v4134_v3, 0.0  ;;  %v4444_v19 = vmax.f32 %v4175_v35, 0.0  ;;  %v3712_v3 = vrot.slane %v7551_v2, %v6428_v9 }
 0x4ab   : > { %v4641_v18 = vmul.f32 %v4532_v58, %v4441_v11  ;;  %v4643_v24 = vmul.f32 %v4540_v13, %v4443_v12  ;;  %v4560_v58 = vrot.slane %v7518_v49, %v7436_v32  ;;  %v3708_v49 = vrot.slane %v7551_v2, %v6425_v8 }
 0x4ac   : > { %v4688_v21 = vadd.f32 %v4687_v28, %v4686_v16  ;;  %v4642_v22 = vmul.f32 %v4536_v37, %v4442_v47  ;;  %v4644_v34 = vmul.f32 %v4544_v54, %v4444_v19  ;;  %v4564_v54 = vrot.slane %v7568_v5, %v6419_v6 }
 0x4ad   : > { %v4689_v55 = vsel %vm4657_vm3, %v4641_v18, 0.0  ;;  %v4693_v1 = vsel %vm4657_vm3, %v4643_v24, 0.0 }
 0x4ae   : > { %v4690_v26 = vadd.f32 %v4689_v55, %v4688_v21  ;;  %v4691_v27 = vsel %vm4657_vm3, %v4642_v22, 0.0  ;;  %v4213_v29 = vpop.f32.mrb[44].mxu0  ;;  %v4254_v30 = vpop.f32.mrb[64].mxu1  ;;  %v4695_v61 = vsel %vm4657_vm3, %v4644_v34, 0.0  ;;  %v4568_v21 = vrot.slane %v7568_v5, %v6425_v8 }
 0x4af   : > { %v4214_v38 = vadd.f32 %v4213_v29, %v3688_v17  ;;  %v4255_v40 = vadd.f32 %v4254_v30, %v3696_v20  ;;  %v4215_v41 = vpop.f32.mrb[45].mxu0  ;;  %v4256_v42 = vpop.f32.mrb[65].mxu1  ;;  %v3720_v8 = vrot.slane %v7551_v2, %v7427_v63 }
 0x4b0   : > { %v4692_v43 = vadd.f32 %v4691_v27, %v4690_v26  ;;  %v4216_v44 = vadd.f32 %v4215_v41, %v3692_v48  ;;  %v4257_v45 = vadd.f32 %v4256_v42, %v3700_v4  ;;  %v4217_v23 = vpop.f32.mrb[46].mxu0  ;;  %v4258_v52 = vpop.f32.mrb[66].mxu1  ;;  %v4572_v27 = vrot.slane %v7568_v5, %v6428_v9 }
 0x4b1   : > { %v4445_v53 = vmax.f32 %v4214_v38, 0.0  ;;  %v4447_v36 = vmax.f32 %v4255_v40, 0.0  ;;  %v4218_v51 = vpop.f32.mrb[47].mxu0  ;;  %v4259_v60 = vpop.f32.mrb[67].mxu1  ;;  %v4576_v38 = vrot.slane %v7568_v5, %v7409_v46  ;;  %v3728_v42 = vrot.slane %v7551_v2, %v7430_v25 }
 0x4b2   : > { %v4694_v56 = vadd.f32 %v4693_v1, %v4692_v43  ;;  %v4446_v57 = vmax.f32 %v4216_v44, 0.0  ;;  %v4448_v0 = vmax.f32 %v4257_v45, 0.0  ;;  %v3724_v9 = vrot.slane %v7551_v2, %v7433_v31 }
 0x4b3   : > { %v4645_v62 = vmul.f32 %v4548_v39, %v4445_v53  ;;  %v4647_v11 = vmul.f32 %v4556_v50, %v4447_v36  ;;  %v4580_v51 = vrot.slane %v7568_v5, %v7427_v63 }
 0x4b4   : > { %v4696_v37 = vadd.f32 %v4695_v61, %v4694_v56  ;;  %v4646_v35 = vmul.f32 %v4552_v33, %v4446_v57  ;;  %v4648_v16 = vmul.f32 %v4560_v58, %v4448_v0  ;;  %v3732_v33 = vrot.slane %v7551_v2, %v7436_v32 }
 0x4b5   : > { %v4697_v10 = vsel %vm4657_vm3, %v4645_v62, 0.0  ;;  %v4701_v55 = vsel %vm4657_vm3, %v4647_v11, 0.0  ;;  %v4584_v2 = vrot.slane %v7568_v5, %v7433_v31  ;;  %v4592_v31 = vrot.slane %v7568_v5, %v7436_v32 }
 0x4b6   : > { %v4698_v12 = vadd.f32 %v4697_v10, %v4696_v37  ;;  %v4699_v13 = vsel %vm4657_vm3, %v4646_v35, 0.0  ;;  %v4295_v14 = vpop.f32.mrb[48].mxu0  ;;  %v4336_v15 = vpop.f32.mrb[68].mxu1  ;;  %v4703_v39 = vsel %vm4657_vm3, %v4648_v16, 0.0 }
 0x4b7   : > { %v4296_v47 = vadd.f32 %v4295_v14, %v3704_v59  ;;  %v4337_v17 = vadd.f32 %v4336_v15, %v3712_v3  ;;  %v4297_v28 = vpop.f32.mrb[49].mxu0  ;;  %v4338_v18 = vpop.f32.mrb[69].mxu1 }
 0x4b8   : > { %v4700_v19 = vadd.f32 %v4699_v13, %v4698_v12  ;;  %v4298_v20 = vadd.f32 %v4297_v28, %v3708_v49  ;;  %v4339_v22 = vadd.f32 %v4338_v18, %v3716_v7  ;;  %v4299_v48 = vpop.f32.mrb[50].mxu0  ;;  %v4340_v4 = vpop.f32.mrb[70].mxu1  ;;  %v4588_v49 = vrot.slane %v7568_v5, %v7430_v25 }
 0x4b9   : > { %v4449_v24 = vmax.f32 %v4296_v47, 0.0  ;;  %v4451_v26 = vmax.f32 %v4337_v17, 0.0  ;;  %v4300_v29 = vpop.f32.mrb[51].mxu0  ;;  %v4341_v6 = vpop.f32.mrb[71].mxu1  ;;  %v4723_v48 = vld [vmem:[#allocation2] sm:$0x1] }
 0x4ba   : > { %v4702_v30 = vadd.f32 %v4701_v55, %v4700_v19  ;;  %v4450_v34 = vmax.f32 %v4298_v20, 0.0  ;;  %v4452_v41 = vmax.f32 %v4339_v22, 0.0 }
 0x4bb   : > { %v4649_v40 = vmul.f32 %v4564_v54, %v4449_v24  ;;  %v4651_v45 = vmul.f32 %v4572_v27, %v4451_v26 }
 0x4bc   : > { %v4704_v43 = vadd.f32 %v4703_v39, %v4702_v30  ;;  %v4650_v44 = vmul.f32 %v4568_v21, %v4450_v34  ;;  %v4652_v36 = vmul.f32 %v4576_v38, %v4452_v41 }
 0x4bd   : > { %v4705_v46 = vsel %vm4657_vm3, %v4649_v40, 0.0  ;;  %v4709_v3 = vsel %vm4657_vm3, %v4651_v45, 0.0 }
 0x4be   : > { %v4706_v23 = vadd.f32 %v4705_v46, %v4704_v43  ;;  %v4707_v52 = vsel %vm4657_vm3, %v4650_v44, 0.0  ;;  %v4377_v1 = vpop.f32.mrb[52].mxu0  ;;  %v4418_v53 = vpop.f32.mrb[72].mxu1  ;;  %v4711_v12 = vsel %vm4657_vm3, %v4652_v36, 0.0 }
 0x4bf   : > { %v4378_v50 = vadd.f32 %v4377_v1, %v3720_v8  ;;  %v4419_v60 = vadd.f32 %v4418_v53, %v3728_v42  ;;  %v4379_v56 = vpop.f32.mrb[53].mxu0  ;;  %v4420_v57 = vpop.f32.mrb[73].mxu1 }
 0x4c0   : > { %v4708_v58 = vadd.f32 %v4707_v52, %v4706_v23  ;;  %v4380_v59 = vadd.f32 %v4379_v56, %v3724_v9  ;;  %v4421_v61 = vadd.f32 %v4420_v57, %v3732_v33  ;;  %v4381_v62 = vpop.f32.mrb[54].mxu0  ;;  %v4422_v0 = vpop.f32.mrb[74].mxu1 }
 0x4c1   : > { %v4453_v37 = vmax.f32 %v4378_v50, 0.0  ;;  %v4455_v35 = vmax.f32 %v4419_v60, 0.0  ;;  %v4382_v7 = vpop.f32.mrb[55].mxu0  ;;  %v4423_v63 = vpop.f32.mrb[75].mxu1 }
 0x4c2   : > { %v4710_v10 = vadd.f32 %v4709_v3, %v4708_v58  ;;  %v4454_v11 = vmax.f32 %v4380_v59, 0.0  ;;  %v4456_v14 = vmax.f32 %v4421_v61, 0.0 }
 0x4c3   : > { %v4653_v13 = vmul.f32 %v4580_v51, %v4453_v37  ;;  %v4655_v54 = vmul.f32 %v4588_v49, %v4455_v35 }
 0x4c4   : > { %v4712_v15 = vadd.f32 %v4711_v12, %v4710_v10  ;;  %v4654_v16 = vmul.f32 %v4584_v2, %v4454_v11  ;;  %v4656_v28 = vmul.f32 %v4592_v31, %v4456_v14 }
 0x4c5   : > { %v4713_v47 = vsel %vm4657_vm3, %v4653_v13, 0.0  ;;  %v4717_v19 = vsel %vm4657_vm3, %v4655_v54, 0.0 }
 0x4c6   : > { %v4714_v17 = vadd.f32 %v4713_v47, %v4712_v15  ;;  %v4715_v25 = vsel %vm4657_vm3, %v4654_v16, 0.0  ;;  %v4719_v21 = vsel %vm4657_vm3, %v4656_v28, 0.0 }
 0x4c8   : > { %v4716_v18 = vadd.f32 %v4715_v25, %v4714_v17 }
 0x4ca   : > { %v4718_v20 = vadd.f32 %v4717_v19, %v4716_v18 }
 0x4cc   : > { %v4720_v22 = vadd.f32 %v4719_v21, %v4718_v20 }
 0x4ce   : > { %4721 = vadd.xlane.f32.xlu0 %v4720_v22 }
 0x55b   : > { %v4722_v32 = vpop.xlane.xlu0 %4721 }
 0x55c   : > { %v4724_v5 = vadd.f32 %v4723_v48, %v4722_v32 }
 0x55e   : > { %4727 = vperm.xlu0 %5568, %v4724_v5  }
 0x5dd   : > { %v4728_v4 = vpop.permute.xlu0 %4727 }
 0x5de   : > { %4730 = vst [vmem:[%s357_s25] sm:$0x1] %v4728_v4 }
 0x5df PF: > { %s22_s15 = sadd.s32 1, %s5996_s15  }
 0x5e0   : > { %p19_p4 = scmp.ge.s32.totalorder %s22_s15, 4  }
 0x5e2   :  { %21 = sbr.rel (!%p19_p4) target bundleno = 3 (0x3), region = 98 }

</bundles_post_ra>
